<compile_context>
chip_gen: v6e
topology: v6e:2x2x1
jax: 0.10.0
libtpu: 0.0.40
codegen_flags: <defaults>
</compile_context>

<pallas_src>
import functools

import numpy as np
import jax
import jax.numpy as jnp
from jax.experimental import pallas as pl
from jax.experimental.pallas import tpu as pltpu

_LN_EPS = 1e-5  # PyTorch nn.LayerNorm default


def _gelu_tanh(x):
    c = 0.7978845608028654  # sqrt(2/pi)
    return 0.5 * x * (1.0 + jnp.tanh(c * (x + 0.044715 * x * x * x)))


def _layernorm(x, gamma, beta):
    mu = jnp.mean(x, axis=-1, keepdims=True)
    xc = x - mu
    var = jnp.mean(xc * xc, axis=-1, keepdims=True)
    return xc * jax.lax.rsqrt(var + _LN_EPS) * gamma + beta


def _channel_attention_kernel(x_ref, wqkv_ref, bqkv_ref, g1_ref, b1_ref,
                              g2_ref, b2_ref, wf1_ref, bf1_ref,
                              wf2_ref, bf2_ref, out_ref,
                              *, num_heads, emb_size, seq_len):
    E, H, C = emb_size, num_heads, seq_len
    dh = E // H
    inv_scale = 1.0 / (float(E) ** 0.5)

    x = x_ref[0]                                            # (C, E)

    # ---- LayerNorm 1 ----
    xn = _layernorm(x, g1_ref[...], b1_ref[...])

    # ---- fused QKV projection (weights pre-transposed, pre-permuted,
    #      Q columns pre-scaled by 1/sqrt(E)) ----
    qkv = jnp.dot(xn, wqkv_ref[...],
                  preferred_element_type=jnp.float32) + bqkv_ref[...]   # (C, 3E)
    q = qkv[:, :E]                      # already scaled: q = Q / sqrt(E)
    k = qkv[:, E:2 * E]
    v = qkv[:, 2 * E:]

    # identity added to logits, pre-scaled: I / sqrt(E), shared across heads
    row = jax.lax.broadcasted_iota(jnp.int32, (C, C), 0)
    col = jax.lax.broadcasted_iota(jnp.int32, (C, C), 1)
    diag = jnp.where(row == col, inv_scale, 0.0)

    head_outs = []
    for h in range(H):                                      # H small & static: unroll
        lo, hi = h * dh, (h + 1) * dh
        qh, kh, vh = q[:, lo:hi], k[:, lo:hi], v[:, lo:hi]
        # qh @ kh^T without an explicit in-kernel transpose; scaling already
        # folded into qh, so logits = (energy + I) / sqrt(E) is just an add.
        logits = jax.lax.dot_general(qh, kh, (((1,), (1,)), ((), ())),
                                     preferred_element_type=jnp.float32) + diag
        m = jnp.max(logits, axis=-1, keepdims=True)
        p = jnp.exp(logits - m)
        s = jnp.sum(p, axis=-1, keepdims=True)
        att = p * pl.reciprocal(s, approx=True)             # EUP recip, no divide
        head_outs.append(jnp.dot(att, vh, preferred_element_type=jnp.float32))
    attn = jnp.concatenate(head_outs, axis=-1)              # (C, E), 'b h n d -> b n (h d)'

    x1 = x + attn                                           # residual 1

    # ---- LayerNorm 2 + FFN ----
    xn2 = _layernorm(x1, g2_ref[...], b2_ref[...])
    hdn = jnp.dot(xn2, wf1_ref[...],
                  preferred_element_type=jnp.float32) + bf1_ref[...]    # (C, 4E)
    hdn = _gelu_tanh(hdn)
    y = jnp.dot(hdn, wf2_ref[...],
                preferred_element_type=jnp.float32) + bf2_ref[...]      # (C, E)

    out_ref[0] = (x1 + y).astype(out_ref.dtype)             # residual 2


def channel_attention_forward(x1, x2, params, *, num_heads):
    """x1: (B, num_nodes, C1), x2: (B, num_nodes, C2) -> (B, num_nodes, C1)."""
    B, E, C1 = x1.shape
    C2 = x2.shape[2]
    C = C1 + C2
    H = num_heads
    dh = E // H
    inv_scale = 1.0 / (float(E) ** 0.5)

    # concat channels, transpose: channels become tokens, nodes the embedding
    x = jnp.transpose(jnp.concatenate([x1, x2], axis=-1), (0, 2, 1))    # (B, C, E)

    wqkv, bqkv = params['qkv']          # (3E, E), (3E,)
    g1, b1 = params['ln1']
    g2, b2 = params['ln2']
    wf1, bf1 = params['ffn1']           # (4E, E), (4E,)
    wf2, bf2 = params['ffn2']           # (E, 4E), (E,)

    # Output-column permutation: interleaved '(h d qkv)' -> [Q | K | V] blocks,
    # each in (h d) order.  Permuting rows of W / entries of b is equivalent to
    # permuting the projection's output columns, so the kernel never gathers.
    perm = np.array([(h * dh + d) * 3 + s
                     for s in range(3) for h in range(H) for d in range(dh)],
                    dtype=np.int32)
    wqkv_t = jnp.transpose(wqkv[perm, :])                   # (E, 3E) pre-transposed
    bqkv_p = bqkv[perm]
    # fold the 1/sqrt(E) attention scaling into the Q columns
    col_scale = jnp.concatenate([jnp.full((E,), inv_scale, jnp.float32),
                                 jnp.ones((2 * E,), jnp.float32)])
    wqkv_t = wqkv_t * col_scale[None, :]
    bqkv_p = (bqkv_p * col_scale).reshape(1, 3 * E)

    kernel = functools.partial(_channel_attention_kernel,
                               num_heads=H, emb_size=E, seq_len=C)

    def rep(shape):  # grid-invariant (replicated) operand
        return pl.BlockSpec(shape, lambda b, _n=len(shape): (0,) * _n)

    out = pl.pallas_call(
        kernel,
        out_shape=jax.ShapeDtypeStruct((B, C, E), jnp.float32),
        grid_spec=pltpu.PrefetchScalarGridSpec(
            num_scalar_prefetch=0,
            grid=(B,),
            in_specs=[
                pl.BlockSpec((1, C, E), lambda b: (b, 0, 0)),   # x (per-batch tile)
                rep((E, 3 * E)), rep((1, 3 * E)),               # fused QKV linear
                rep((1, E)), rep((1, E)),                       # layernorm1
                rep((1, E)), rep((1, E)),                       # layernorm2
                rep((E, 4 * E)), rep((1, 4 * E)),               # FFN linear1
                rep((4 * E, E)), rep((1, E)),                   # FFN linear2
            ],
            out_specs=pl.BlockSpec((1, C, E), lambda b: (b, 0, 0)),
        ),
        compiler_params=pltpu.CompilerParams(
            dimension_semantics=("parallel",)),                 # 2 TCs on v7x
    )(x, wqkv_t, bqkv_p,
      g1.reshape(1, E), b1.reshape(1, E),
      g2.reshape(1, E), b2.reshape(1, E),
      jnp.transpose(wf1), bf1.reshape(1, 4 * E),
      jnp.transpose(wf2), bf2.reshape(1, E))

    # back to (B, num_nodes, channels), keep the first C1 channels
    return jnp.transpose(out, (0, 2, 1))[:, :, :C1]


def init_params(rng, num_nodes):
    """Deterministic synthetic parameters (PyTorch Linear layout: W is (out, in))."""
    E = num_nodes
    ks = jax.random.split(rng, 10)

    def lin(kw, kb, out_dim, in_dim):
        lim = 1.0 / (in_dim ** 0.5)
        w = jax.random.uniform(kw, (out_dim, in_dim), jnp.float32, -lim, lim)
        b = jax.random.uniform(kb, (out_dim,), jnp.float32, -lim, lim)
        return w, b

    return {
        'qkv':  lin(ks[0], ks[1], 3 * E, E),
        'ffn1': lin(ks[2], ks[3], 4 * E, E),
        'ffn2': lin(ks[4], ks[5], E, 4 * E),
        'ln1': (1.0 + 0.05 * jax.random.normal(ks[6], (E,), jnp.float32),
                0.05 * jax.random.normal(ks[7], (E,), jnp.float32)),
        'ln2': (1.0 + 0.05 * jax.random.normal(ks[8], (E,), jnp.float32),
                0.05 * jax.random.normal(ks[9], (E,), jnp.float32)),
    }


def reference_forward(x1, x2, params, *, num_heads):
    """Plain-JAX mirror of the PyTorch Channel_Attention forward (eval mode)."""
    hp = jax.lax.Precision.HIGHEST
    x = jnp.transpose(jnp.concatenate([x1, x2], axis=-1), (0, 2, 1))    # (B, C, E)
    B, C, E = x.shape
    H = num_heads
    dh = E // H

    wqkv, bqkv = params['qkv']
    g1, b1 = params['ln1']
    g2, b2 = params['ln2']
    wf1, bf1 = params['ffn1']
    wf2, bf2 = params['ffn2']

    # --- multi-head attention (pre-LN) ---
    xn = _layernorm(x, g1, b1)
    proj = jnp.einsum('bce,fe->bcf', xn, wqkv, precision=hp) + bqkv     # (B, C, 3E)
    proj = proj.reshape(B, C, H, dh, 3)                                 # 'b n (h d qkv)'
    q = jnp.transpose(proj[..., 0], (0, 2, 1, 3))                       # (B, H, C, dh)
    k = jnp.transpose(proj[..., 1], (0, 2, 1, 3))
    v = jnp.transpose(proj[..., 2], (0, 2, 1, 3))
    energy = jnp.einsum('bhqd,bhkd->bhqk', q, k, precision=hp)
    att = jax.nn.softmax((energy + jnp.eye(C)) / (E ** 0.5), axis=-1)   # add_diag=True
    out = jnp.einsum('bhqk,bhkd->bhqd', att, v, precision=hp)
    out = jnp.transpose(out, (0, 2, 1, 3)).reshape(B, C, E)
    xa = x + out

    # --- FFN (pre-LN) ---
    xn2 = _layernorm(xa, g2, b2)
    hdn = _gelu_tanh(jnp.einsum('bce,fe->bcf', xn2, wf1, precision=hp) + bf1)
    y = jnp.einsum('bcf,ef->bce', hdn, wf2, precision=hp) + bf2
    xa = xa + y

    return jnp.transpose(xa, (0, 2, 1))[:, :, :x1.shape[2]]


if __name__ == "__main__":
    num_nodes = 32                                  # != 49 -> 4 heads (module rule)
    num_heads = 1 if num_nodes == 49 else 4
    B, C1, C2 = 2, 12, 12

    root = jax.random.PRNGKey(0)
    kp, kx1, kx2 = jax.random.split(root, 3)
    params = init_params(kp, num_nodes)
    x1 = jax.random.normal(kx1, (B, num_nodes, C1), jnp.float32)
    x2 = jax.random.normal(kx2, (B, num_nodes, C2), jnp.float32)

    out = channel_attention_forward(x1, x2, params, num_heads=num_heads)
    jax.block_until_ready(out)

    ref = reference_forward(x1, x2, params, num_heads=num_heads)
    assert out.shape == (B, num_nodes, C1)
    assert jnp.allclose(out, ref, atol=1e-3, rtol=1e-3), \
        float(jnp.max(jnp.abs(out - ref)))

    print("KERNEL_OK")
</pallas_src>

<mosaic_0001>
module attributes {stable_mosaic.version = 11 : i64} {
  func.func @_channel_attention_kernel(%arg0: i32, %arg1: memref<1x24x32xf32, #tpu.memory_space<vmem>>, %arg2: memref<32x96xf32, #tpu.memory_space<vmem>>, %arg3: memref<1x96xf32, #tpu.memory_space<vmem>>, %arg4: memref<1x32xf32, #tpu.memory_space<vmem>>, %arg5: memref<1x32xf32, #tpu.memory_space<vmem>>, %arg6: memref<1x32xf32, #tpu.memory_space<vmem>>, %arg7: memref<1x32xf32, #tpu.memory_space<vmem>>, %arg8: memref<32x128xf32, #tpu.memory_space<vmem>>, %arg9: memref<1x128xf32, #tpu.memory_space<vmem>>, %arg10: memref<128x32xf32, #tpu.memory_space<vmem>>, %arg11: memref<1x32xf32, #tpu.memory_space<vmem>>, %arg12: memref<1x24x32xf32, #tpu.memory_space<vmem>>) attributes {dimension_semantics = [#tpu.dimension_semantics<parallel>], iteration_bounds = array<i64: 2>, scalar_prefetch = 0 : i64, scratch_operands = 0 : i64, tpu.core_type = #tpu.core_type<tc>, window_params = [{transform_indices = @transform_0, window_bounds = array<i64: 1, 24, 32>}, {pipeline_mode = #tpu.pipeline_mode<synchronous>, transform_indices = @transform_1, window_bounds = array<i64: 32, 96>}, {pipeline_mode = #tpu.pipeline_mode<synchronous>, transform_indices = @transform_2, window_bounds = array<i64: 1, 96>}, {pipeline_mode = #tpu.pipeline_mode<synchronous>, transform_indices = @transform_3, window_bounds = array<i64: 1, 32>}, {pipeline_mode = #tpu.pipeline_mode<synchronous>, transform_indices = @transform_4, window_bounds = array<i64: 1, 32>}, {pipeline_mode = #tpu.pipeline_mode<synchronous>, transform_indices = @transform_5, window_bounds = array<i64: 1, 32>}, {pipeline_mode = #tpu.pipeline_mode<synchronous>, transform_indices = @transform_6, window_bounds = array<i64: 1, 32>}, {pipeline_mode = #tpu.pipeline_mode<synchronous>, transform_indices = @transform_7, window_bounds = array<i64: 32, 128>}, {pipeline_mode = #tpu.pipeline_mode<synchronous>, transform_indices = @transform_8, window_bounds = array<i64: 1, 128>}, {pipeline_mode = #tpu.pipeline_mode<synchronous>, transform_indices = @transform_9, window_bounds = array<i64: 128, 32>}, {pipeline_mode = #tpu.pipeline_mode<synchronous>, transform_indices = @transform_10, window_bounds = array<i64: 1, 32>}, {transform_indices = @transform_11, window_bounds = array<i64: 1, 24, 32>}]} {
    %c0 = arith.constant 0 : index
    %c0_0 = arith.constant 0 : index
    %c0_1 = arith.constant 0 : index
    %0 = vector.load %arg1[%c0, %c0_0, %c0_1] : memref<1x24x32xf32, #tpu.memory_space<vmem>>, vector<1x24x32xf32>
    %1 = vector.shape_cast %0 : vector<1x24x32xf32> to vector<24x32xf32>
    %c0_2 = arith.constant 0 : index
    %c0_3 = arith.constant 0 : index
    %2 = vector.load %arg4[%c0_2, %c0_3] : memref<1x32xf32, #tpu.memory_space<vmem>>, vector<1x32xf32>
    %c0_4 = arith.constant 0 : index
    %c0_5 = arith.constant 0 : index
    %3 = vector.load %arg5[%c0_4, %c0_5] : memref<1x32xf32, #tpu.memory_space<vmem>>, vector<1x32xf32>
    %cst = arith.constant dense<0.000000e+00> : vector<24xf32>
    %4 = vector.multi_reduction <add>, %1, %cst [1] : vector<24x32xf32> to vector<24xf32>
    %5 = vector.shape_cast %4 : vector<24xf32> to vector<24x1xf32>
    %cst_6 = arith.constant 3.200000e+01 : f32
    %6 = vector.broadcast %cst_6 : f32 to vector<24x1xf32>
    %7 = arith.divf %5, %6 : vector<24x1xf32>
    %8 = vector.broadcast %7 : vector<24x1xf32> to vector<24x32xf32>
    %9 = arith.subf %1, %8 : vector<24x32xf32>
    %10 = arith.mulf %9, %9 : vector<24x32xf32>
    %cst_7 = arith.constant dense<0.000000e+00> : vector<24xf32>
    %11 = vector.multi_reduction <add>, %10, %cst_7 [1] : vector<24x32xf32> to vector<24xf32>
    %12 = vector.shape_cast %11 : vector<24xf32> to vector<24x1xf32>
    %cst_8 = arith.constant 3.200000e+01 : f32
    %13 = vector.broadcast %cst_8 : f32 to vector<24x1xf32>
    %14 = arith.divf %12, %13 : vector<24x1xf32>
    %cst_9 = arith.constant 9.99999974E-6 : f32
    %15 = vector.broadcast %cst_9 : f32 to vector<24x1xf32>
    %16 = arith.addf %14, %15 : vector<24x1xf32>
    %17 = math.rsqrt %16 : vector<24x1xf32>
    %18 = vector.broadcast %17 : vector<24x1xf32> to vector<24x32xf32>
    %19 = arith.mulf %9, %18 : vector<24x32xf32>
    %20 = vector.broadcast %2 : vector<1x32xf32> to vector<24x32xf32>
    %21 = arith.mulf %19, %20 : vector<24x32xf32>
    %22 = vector.broadcast %3 : vector<1x32xf32> to vector<24x32xf32>
    %23 = arith.addf %21, %22 : vector<24x32xf32>
    %c0_10 = arith.constant 0 : index
    %c0_11 = arith.constant 0 : index
    %24 = vector.load %arg2[%c0_10, %c0_11] : memref<32x96xf32, #tpu.memory_space<vmem>>, vector<32x96xf32>
    %cst_12 = arith.constant dense<0.000000e+00> : vector<24x96xf32>
    %25 = tpu.matmul %23, %24, %cst_12 {dimension_numbers = #tpu.dot_dimension_numbers<[1], [0], [0], [1], [0, 0, 1, 1], [], []>} : vector<24x32xf32>, vector<32x96xf32>, vector<24x96xf32> -> vector<24x96xf32>
    %c0_13 = arith.constant 0 : index
    %c0_14 = arith.constant 0 : index
    %26 = vector.load %arg3[%c0_13, %c0_14] : memref<1x96xf32, #tpu.memory_space<vmem>>, vector<1x96xf32>
    %27 = vector.broadcast %26 : vector<1x96xf32> to vector<24x96xf32>
    %28 = arith.addf %25, %27 : vector<24x96xf32>
    %29 = vector.extract_strided_slice %28 {offsets = [0, 0], sizes = [24, 32], strides = [1, 1]} : vector<24x96xf32> to vector<24x32xf32>
    %30 = vector.extract_strided_slice %28 {offsets = [0, 32], sizes = [24, 32], strides = [1, 1]} : vector<24x96xf32> to vector<24x32xf32>
    %31 = vector.extract_strided_slice %28 {offsets = [0, 64], sizes = [24, 32], strides = [1, 1]} : vector<24x96xf32> to vector<24x32xf32>
    %32 = tpu.iota {dimensions = array<i32: 0>} : vector<24x24xi32>
    %33 = tpu.iota {dimensions = array<i32: 1>} : vector<24x24xi32>
    %34 = arith.cmpi eq, %32, %33 : vector<24x24xi32>
    %cst_15 = arith.constant 0.176776692 : f32
    %cst_16 = arith.constant 0.000000e+00 : f32
    %35 = vector.broadcast %cst_15 : f32 to vector<24x24xf32>
    %36 = vector.broadcast %cst_16 : f32 to vector<24x24xf32>
    %37 = arith.select %34, %35, %36 : vector<24x24xi1>, vector<24x24xf32>
    %38 = vector.extract_strided_slice %29 {offsets = [0, 0], sizes = [24, 8], strides = [1, 1]} : vector<24x32xf32> to vector<24x8xf32>
    %39 = vector.extract_strided_slice %30 {offsets = [0, 0], sizes = [24, 8], strides = [1, 1]} : vector<24x32xf32> to vector<24x8xf32>
    %40 = vector.extract_strided_slice %31 {offsets = [0, 0], sizes = [24, 8], strides = [1, 1]} : vector<24x32xf32> to vector<24x8xf32>
    %cst_17 = arith.constant dense<0.000000e+00> : vector<24x24xf32>
    %41 = tpu.matmul %38, %39, %cst_17 {dimension_numbers = #tpu.dot_dimension_numbers<[1], [1], [0], [0], [0, 0, 1, 0], [], []>} : vector<24x8xf32>, vector<24x8xf32>, vector<24x24xf32> -> vector<24x24xf32>
    %42 = arith.addf %41, %37 : vector<24x24xf32>
    %cst_18 = arith.constant dense<0xFF800000> : vector<24xf32>
    %43 = vector.multi_reduction <maximumf>, %42, %cst_18 [1] : vector<24x24xf32> to vector<24xf32>
    %44 = vector.shape_cast %43 : vector<24xf32> to vector<24x1xf32>
    %45 = vector.broadcast %44 : vector<24x1xf32> to vector<24x24xf32>
    %46 = arith.subf %42, %45 : vector<24x24xf32>
    %47 = math.exp %46 : vector<24x24xf32>
    %cst_19 = arith.constant dense<0.000000e+00> : vector<24xf32>
    %48 = vector.multi_reduction <add>, %47, %cst_19 [1] : vector<24x24xf32> to vector<24xf32>
    %49 = vector.shape_cast %48 : vector<24xf32> to vector<24x1xf32>
    %50 = tpu.reciprocal %49 {approx = true} : vector<24x1xf32> -> vector<24x1xf32>
    %51 = vector.broadcast %50 : vector<24x1xf32> to vector<24x24xf32>
    %52 = arith.mulf %47, %51 : vector<24x24xf32>
    %cst_20 = arith.constant dense<0.000000e+00> : vector<24x8xf32>
    %53 = tpu.matmul %52, %40, %cst_20 {dimension_numbers = #tpu.dot_dimension_numbers<[1], [0], [0], [1], [0, 0, 1, 1], [], []>} : vector<24x24xf32>, vector<24x8xf32>, vector<24x8xf32> -> vector<24x8xf32>
    %54 = vector.extract_strided_slice %29 {offsets = [0, 8], sizes = [24, 8], strides = [1, 1]} : vector<24x32xf32> to vector<24x8xf32>
    %55 = vector.extract_strided_slice %30 {offsets = [0, 8], sizes = [24, 8], strides = [1, 1]} : vector<24x32xf32> to vector<24x8xf32>
    %56 = vector.extract_strided_slice %31 {offsets = [0, 8], sizes = [24, 8], strides = [1, 1]} : vector<24x32xf32> to vector<24x8xf32>
    %cst_21 = arith.constant dense<0.000000e+00> : vector<24x24xf32>
    %57 = tpu.matmul %54, %55, %cst_21 {dimension_numbers = #tpu.dot_dimension_numbers<[1], [1], [0], [0], [0, 0, 1, 0], [], []>} : vector<24x8xf32>, vector<24x8xf32>, vector<24x24xf32> -> vector<24x24xf32>
    %58 = arith.addf %57, %37 : vector<24x24xf32>
    %cst_22 = arith.constant dense<0xFF800000> : vector<24xf32>
    %59 = vector.multi_reduction <maximumf>, %58, %cst_22 [1] : vector<24x24xf32> to vector<24xf32>
    %60 = vector.shape_cast %59 : vector<24xf32> to vector<24x1xf32>
    %61 = vector.broadcast %60 : vector<24x1xf32> to vector<24x24xf32>
    %62 = arith.subf %58, %61 : vector<24x24xf32>
    %63 = math.exp %62 : vector<24x24xf32>
    %cst_23 = arith.constant dense<0.000000e+00> : vector<24xf32>
    %64 = vector.multi_reduction <add>, %63, %cst_23 [1] : vector<24x24xf32> to vector<24xf32>
    %65 = vector.shape_cast %64 : vector<24xf32> to vector<24x1xf32>
    %66 = tpu.reciprocal %65 {approx = true} : vector<24x1xf32> -> vector<24x1xf32>
    %67 = vector.broadcast %66 : vector<24x1xf32> to vector<24x24xf32>
    %68 = arith.mulf %63, %67 : vector<24x24xf32>
    %cst_24 = arith.constant dense<0.000000e+00> : vector<24x8xf32>
    %69 = tpu.matmul %68, %56, %cst_24 {dimension_numbers = #tpu.dot_dimension_numbers<[1], [0], [0], [1], [0, 0, 1, 1], [], []>} : vector<24x24xf32>, vector<24x8xf32>, vector<24x8xf32> -> vector<24x8xf32>
    %70 = vector.extract_strided_slice %29 {offsets = [0, 16], sizes = [24, 8], strides = [1, 1]} : vector<24x32xf32> to vector<24x8xf32>
    %71 = vector.extract_strided_slice %30 {offsets = [0, 16], sizes = [24, 8], strides = [1, 1]} : vector<24x32xf32> to vector<24x8xf32>
    %72 = vector.extract_strided_slice %31 {offsets = [0, 16], sizes = [24, 8], strides = [1, 1]} : vector<24x32xf32> to vector<24x8xf32>
    %cst_25 = arith.constant dense<0.000000e+00> : vector<24x24xf32>
    %73 = tpu.matmul %70, %71, %cst_25 {dimension_numbers = #tpu.dot_dimension_numbers<[1], [1], [0], [0], [0, 0, 1, 0], [], []>} : vector<24x8xf32>, vector<24x8xf32>, vector<24x24xf32> -> vector<24x24xf32>
    %74 = arith.addf %73, %37 : vector<24x24xf32>
    %cst_26 = arith.constant dense<0xFF800000> : vector<24xf32>
    %75 = vector.multi_reduction <maximumf>, %74, %cst_26 [1] : vector<24x24xf32> to vector<24xf32>
    %76 = vector.shape_cast %75 : vector<24xf32> to vector<24x1xf32>
    %77 = vector.broadcast %76 : vector<24x1xf32> to vector<24x24xf32>
    %78 = arith.subf %74, %77 : vector<24x24xf32>
    %79 = math.exp %78 : vector<24x24xf32>
    %cst_27 = arith.constant dense<0.000000e+00> : vector<24xf32>
    %80 = vector.multi_reduction <add>, %79, %cst_27 [1] : vector<24x24xf32> to vector<24xf32>
    %81 = vector.shape_cast %80 : vector<24xf32> to vector<24x1xf32>
    %82 = tpu.reciprocal %81 {approx = true} : vector<24x1xf32> -> vector<24x1xf32>
    %83 = vector.broadcast %82 : vector<24x1xf32> to vector<24x24xf32>
    %84 = arith.mulf %79, %83 : vector<24x24xf32>
    %cst_28 = arith.constant dense<0.000000e+00> : vector<24x8xf32>
    %85 = tpu.matmul %84, %72, %cst_28 {dimension_numbers = #tpu.dot_dimension_numbers<[1], [0], [0], [1], [0, 0, 1, 1], [], []>} : vector<24x24xf32>, vector<24x8xf32>, vector<24x8xf32> -> vector<24x8xf32>
    %86 = vector.extract_strided_slice %29 {offsets = [0, 24], sizes = [24, 8], strides = [1, 1]} : vector<24x32xf32> to vector<24x8xf32>
    %87 = vector.extract_strided_slice %30 {offsets = [0, 24], sizes = [24, 8], strides = [1, 1]} : vector<24x32xf32> to vector<24x8xf32>
    %88 = vector.extract_strided_slice %31 {offsets = [0, 24], sizes = [24, 8], strides = [1, 1]} : vector<24x32xf32> to vector<24x8xf32>
    %cst_29 = arith.constant dense<0.000000e+00> : vector<24x24xf32>
    %89 = tpu.matmul %86, %87, %cst_29 {dimension_numbers = #tpu.dot_dimension_numbers<[1], [1], [0], [0], [0, 0, 1, 0], [], []>} : vector<24x8xf32>, vector<24x8xf32>, vector<24x24xf32> -> vector<24x24xf32>
    %90 = arith.addf %89, %37 : vector<24x24xf32>
    %cst_30 = arith.constant dense<0xFF800000> : vector<24xf32>
    %91 = vector.multi_reduction <maximumf>, %90, %cst_30 [1] : vector<24x24xf32> to vector<24xf32>
    %92 = vector.shape_cast %91 : vector<24xf32> to vector<24x1xf32>
    %93 = vector.broadcast %92 : vector<24x1xf32> to vector<24x24xf32>
    %94 = arith.subf %90, %93 : vector<24x24xf32>
    %95 = math.exp %94 : vector<24x24xf32>
    %cst_31 = arith.constant dense<0.000000e+00> : vector<24xf32>
    %96 = vector.multi_reduction <add>, %95, %cst_31 [1] : vector<24x24xf32> to vector<24xf32>
    %97 = vector.shape_cast %96 : vector<24xf32> to vector<24x1xf32>
    %98 = tpu.reciprocal %97 {approx = true} : vector<24x1xf32> -> vector<24x1xf32>
    %99 = vector.broadcast %98 : vector<24x1xf32> to vector<24x24xf32>
    %100 = arith.mulf %95, %99 : vector<24x24xf32>
    %cst_32 = arith.constant dense<0.000000e+00> : vector<24x8xf32>
    %101 = tpu.matmul %100, %88, %cst_32 {dimension_numbers = #tpu.dot_dimension_numbers<[1], [0], [0], [1], [0, 0, 1, 1], [], []>} : vector<24x24xf32>, vector<24x8xf32>, vector<24x8xf32> -> vector<24x8xf32>
    %102 = tpu.concatenate %53, %69, %85, %101 in 1 : vector<24x8xf32>, vector<24x8xf32>, vector<24x8xf32>, vector<24x8xf32> -> vector<24x32xf32>
    %103 = arith.addf %1, %102 : vector<24x32xf32>
    %c0_33 = arith.constant 0 : index
    %c0_34 = arith.constant 0 : index
    %104 = vector.load %arg6[%c0_33, %c0_34] : memref<1x32xf32, #tpu.memory_space<vmem>>, vector<1x32xf32>
    %c0_35 = arith.constant 0 : index
    %c0_36 = arith.constant 0 : index
    %105 = vector.load %arg7[%c0_35, %c0_36] : memref<1x32xf32, #tpu.memory_space<vmem>>, vector<1x32xf32>
    %cst_37 = arith.constant dense<0.000000e+00> : vector<24xf32>
    %106 = vector.multi_reduction <add>, %103, %cst_37 [1] : vector<24x32xf32> to vector<24xf32>
    %107 = vector.shape_cast %106 : vector<24xf32> to vector<24x1xf32>
    %cst_38 = arith.constant 3.200000e+01 : f32
    %108 = vector.broadcast %cst_38 : f32 to vector<24x1xf32>
    %109 = arith.divf %107, %108 : vector<24x1xf32>
    %110 = vector.broadcast %109 : vector<24x1xf32> to vector<24x32xf32>
    %111 = arith.subf %103, %110 : vector<24x32xf32>
    %112 = arith.mulf %111, %111 : vector<24x32xf32>
    %cst_39 = arith.constant dense<0.000000e+00> : vector<24xf32>
    %113 = vector.multi_reduction <add>, %112, %cst_39 [1] : vector<24x32xf32> to vector<24xf32>
    %114 = vector.shape_cast %113 : vector<24xf32> to vector<24x1xf32>
    %cst_40 = arith.constant 3.200000e+01 : f32
    %115 = vector.broadcast %cst_40 : f32 to vector<24x1xf32>
    %116 = arith.divf %114, %115 : vector<24x1xf32>
    %cst_41 = arith.constant 9.99999974E-6 : f32
    %117 = vector.broadcast %cst_41 : f32 to vector<24x1xf32>
    %118 = arith.addf %116, %117 : vector<24x1xf32>
    %119 = math.rsqrt %118 : vector<24x1xf32>
    %120 = vector.broadcast %119 : vector<24x1xf32> to vector<24x32xf32>
    %121 = arith.mulf %111, %120 : vector<24x32xf32>
    %122 = vector.broadcast %104 : vector<1x32xf32> to vector<24x32xf32>
    %123 = arith.mulf %121, %122 : vector<24x32xf32>
    %124 = vector.broadcast %105 : vector<1x32xf32> to vector<24x32xf32>
    %125 = arith.addf %123, %124 : vector<24x32xf32>
    %c0_42 = arith.constant 0 : index
    %c0_43 = arith.constant 0 : index
    %126 = vector.load %arg8[%c0_42, %c0_43] : memref<32x128xf32, #tpu.memory_space<vmem>>, vector<32x128xf32>
    %cst_44 = arith.constant dense<0.000000e+00> : vector<24x128xf32>
    %127 = tpu.matmul %125, %126, %cst_44 {dimension_numbers = #tpu.dot_dimension_numbers<[1], [0], [0], [1], [0, 0, 1, 1], [], []>} : vector<24x32xf32>, vector<32x128xf32>, vector<24x128xf32> -> vector<24x128xf32>
    %c0_45 = arith.constant 0 : index
    %c0_46 = arith.constant 0 : index
    %128 = vector.load %arg9[%c0_45, %c0_46] : memref<1x128xf32, #tpu.memory_space<vmem>>, vector<1x128xf32>
    %129 = vector.broadcast %128 : vector<1x128xf32> to vector<24x128xf32>
    %130 = arith.addf %127, %129 : vector<24x128xf32>
    %cst_47 = arith.constant 5.000000e-01 : f32
    %131 = vector.broadcast %cst_47 : f32 to vector<24x128xf32>
    %132 = arith.mulf %131, %130 : vector<24x128xf32>
    %cst_48 = arith.constant 4.471500e-02 : f32
    %133 = vector.broadcast %cst_48 : f32 to vector<24x128xf32>
    %134 = arith.mulf %133, %130 : vector<24x128xf32>
    %135 = arith.mulf %134, %130 : vector<24x128xf32>
    %136 = arith.mulf %135, %130 : vector<24x128xf32>
    %137 = arith.addf %130, %136 : vector<24x128xf32>
    %cst_49 = arith.constant 0.797884583 : f32
    %138 = vector.broadcast %cst_49 : f32 to vector<24x128xf32>
    %139 = arith.mulf %138, %137 : vector<24x128xf32>
    %140 = math.tanh %139 : vector<24x128xf32>
    %cst_50 = arith.constant 1.000000e+00 : f32
    %141 = vector.broadcast %cst_50 : f32 to vector<24x128xf32>
    %142 = arith.addf %141, %140 : vector<24x128xf32>
    %143 = arith.mulf %132, %142 : vector<24x128xf32>
    %c0_51 = arith.constant 0 : index
    %c0_52 = arith.constant 0 : index
    %144 = vector.load %arg10[%c0_51, %c0_52] : memref<128x32xf32, #tpu.memory_space<vmem>>, vector<128x32xf32>
    %cst_53 = arith.constant dense<0.000000e+00> : vector<24x32xf32>
    %145 = tpu.matmul %143, %144, %cst_53 {dimension_numbers = #tpu.dot_dimension_numbers<[1], [0], [0], [1], [0, 0, 1, 1], [], []>} : vector<24x128xf32>, vector<128x32xf32>, vector<24x32xf32> -> vector<24x32xf32>
    %c0_54 = arith.constant 0 : index
    %c0_55 = arith.constant 0 : index
    %146 = vector.load %arg11[%c0_54, %c0_55] : memref<1x32xf32, #tpu.memory_space<vmem>>, vector<1x32xf32>
    %147 = vector.broadcast %146 : vector<1x32xf32> to vector<24x32xf32>
    %148 = arith.addf %145, %147 : vector<24x32xf32>
    %149 = arith.addf %103, %148 : vector<24x32xf32>
    %c0_56 = arith.constant 0 : index
    %c0_57 = arith.constant 0 : index
    %c0_58 = arith.constant 0 : index
    %150 = vector.load %arg12[%c0_56, %c0_57, %c0_58] : memref<1x24x32xf32, #tpu.memory_space<vmem>>, vector<1x24x32xf32>
    %151 = vector.shape_cast %150 : vector<1x24x32xf32> to vector<24x32xf32>
    %152 = vector.shape_cast %149 : vector<24x32xf32> to vector<1x24x32xf32>
    tpu.vector_store %arg12[%c0_56, %c0_57, %c0_58], %152 {strides = array<i32>} : memref<1x24x32xf32, #tpu.memory_space<vmem>>, vector<1x24x32xf32>,
    return
  }
  func.func @transform_0(%arg0: i32) -> (i32, i32, i32) {
    %c0_i32 = arith.constant 0 : i32
    %c0_i32_0 = arith.constant 0 : i32
    %c0_i32_1 = arith.constant 0 : i32
    return %arg0, %c0_i32, %c0_i32_0 : i32, i32, i32
  }
  func.func @transform_1(%arg0: i32) -> (i32, i32) {
    %c0_i32 = arith.constant 0 : i32
    %c0_i32_0 = arith.constant 0 : i32
    %c0_i32_1 = arith.constant 0 : i32
    return %c0_i32, %c0_i32_0 : i32, i32
  }
  func.func @transform_2(%arg0: i32) -> (i32, i32) {
    %c0_i32 = arith.constant 0 : i32
    %c0_i32_0 = arith.constant 0 : i32
    %c0_i32_1 = arith.constant 0 : i32
    return %c0_i32, %c0_i32_0 : i32, i32
  }
  func.func @transform_3(%arg0: i32) -> (i32, i32) {
    %c0_i32 = arith.constant 0 : i32
    %c0_i32_0 = arith.constant 0 : i32
    %c0_i32_1 = arith.constant 0 : i32
    return %c0_i32, %c0_i32_0 : i32, i32
  }
  func.func @transform_4(%arg0: i32) -> (i32, i32) {
    %c0_i32 = arith.constant 0 : i32
    %c0_i32_0 = arith.constant 0 : i32
    %c0_i32_1 = arith.constant 0 : i32
    return %c0_i32, %c0_i32_0 : i32, i32
  }
  func.func @transform_5(%arg0: i32) -> (i32, i32) {
    %c0_i32 = arith.constant 0 : i32
    %c0_i32_0 = arith.constant 0 : i32
    %c0_i32_1 = arith.constant 0 : i32
    return %c0_i32, %c0_i32_0 : i32, i32
  }
  func.func @transform_6(%arg0: i32) -> (i32, i32) {
    %c0_i32 = arith.constant 0 : i32
    %c0_i32_0 = arith.constant 0 : i32
    %c0_i32_1 = arith.constant 0 : i32
    return %c0_i32, %c0_i32_0 : i32, i32
  }
  func.func @transform_7(%arg0: i32) -> (i32, i32) {
    %c0_i32 = arith.constant 0 : i32
    %c0_i32_0 = arith.constant 0 : i32
    %c0_i32_1 = arith.constant 0 : i32
    return %c0_i32, %c0_i32_0 : i32, i32
  }
  func.func @transform_8(%arg0: i32) -> (i32, i32) {
    %c0_i32 = arith.constant 0 : i32
    %c0_i32_0 = arith.constant 0 : i32
    %c0_i32_1 = arith.constant 0 : i32
    return %c0_i32, %c0_i32_0 : i32, i32
  }
  func.func @transform_9(%arg0: i32) -> (i32, i32) {
    %c0_i32 = arith.constant 0 : i32
    %c0_i32_0 = arith.constant 0 : i32
    %c0_i32_1 = arith.constant 0 : i32
    return %c0_i32, %c0_i32_0 : i32, i32
  }
  func.func @transform_10(%arg0: i32) -> (i32, i32) {
    %c0_i32 = arith.constant 0 : i32
    %c0_i32_0 = arith.constant 0 : i32
    %c0_i32_1 = arith.constant 0 : i32
    return %c0_i32, %c0_i32_0 : i32, i32
  }
  func.func @transform_11(%arg0: i32) -> (i32, i32, i32) {
    %c0_i32 = arith.constant 0 : i32
    %c0_i32_0 = arith.constant 0 : i32
    %c0_i32_1 = arith.constant 0 : i32
    return %arg0, %c0_i32, %c0_i32_0 : i32, i32, i32
  }
}

</mosaic_0001>

<bundles_post_ra>
// kernel: tpu_custom_call.1
= control target key start
LH: loop header
LB: loop body
LE: loop exit
PB: predicated region body
PF: predicated region fallthrough
CT: control target
= control target key end

     0   :  { %s3097_s0 = inlined_call_operand.vmem [shape: f32[2,24,32], index: 0, kind: input, shape index: {}]   ;;  %s3098_s1 = inlined_call_operand.vmem [shape: f32[32,96], index: 1, kind: input, shape index: {}]   ;;  %s3099_s2 = inlined_call_operand.vmem [shape: f32[1,96], index: 2, kind: input, shape index: {}]   ;;  %s3100_s3 = inlined_call_operand.vmem [shape: f32[1,32], index: 3, kind: input, shape index: {}]   ;;  %s3101_s4 = inlined_call_operand.vmem [shape: f32[1,32], index: 4, kind: input, shape index: {}]   ;;  %s3102_s5 = inlined_call_operand.vmem [shape: f32[1,32], index: 5, kind: input, shape index: {}]   ;;  %s3103_s6 = inlined_call_operand.vmem [shape: f32[1,32], index: 6, kind: input, shape index: {}]   ;;  %s3104_s7 = inlined_call_operand.vmem [shape: f32[32,128], index: 7, kind: input, shape index: {}]   ;;  %s3105_s8 = inlined_call_operand.vmem [shape: f32[1,128], index: 8, kind: input, shape index: {}]   ;;  %s3106_s9 = inlined_call_operand.vmem [shape: f32[128,32], index: 9, kind: input, shape index: {}]   ;;  %s3107_s10 = inlined_call_operand.vmem [shape: f32[1,32], index: 10, kind: input, shape index: {}]   ;;  %s3108_s11 = inlined_call_operand.hbm [shape: f32[2,24,32], index: 11, kind: output, shape index: {}]  }
   0x1   :  { %3110 = sst [smem:[#allocation5_spill]] %s3097_s0 }
   0x2   :  { %16 = vsyncpa [#allocation3], 0 }
   0x3   :  { %18 = vsyncpa [#allocation3 + $0x1], 0  ;;  %s2520_s17 = smov 0   ;;  %s2522_s18 = smov 0  }
   0x4   :  { %s2524_s19 = smov 0   ;;  %s2526_s20 = smov 0  }
   0x5 LB: > { %s2541_s21 = sadd.s32 4294967295, %s2440_s20   ;;  %s1920_s22 = sadd.s32 4294967294, %s2440_s20   ;;  %s2440_s20 = sphi %s2526_s20, %s3118_s20   ;;  %s2436_s19 = sphi %s2524_s19, %s3117_s19   ;;  %s2432_s18 = sphi %s2522_s18, %s3116_s18   ;;  %s2428_s17 = sphi %s2520_s17, %s3115_s17  }
   0x6   : > { %s2545_s23 = sadd.s32 1, %s2440_s20   ;;  %s267_s24 = sadd.s32 1, %s2436_s19 }
   0x7   : > { %s264_s25 = ssub.s32 %s2440_s20, %s2545_s23  ;;  %p277_p0 = scmp.ne.s32.totalorder %s2436_s19, %s2432_s18 }
   0x8   : > { %p265_p1 = scmp.eq.s32.totalorder %s264_s25, 0  ;;  %p278_p2 = scmp.eq.s32.totalorder %s2541_s21, 1 }
   0x9   : > { %p283_p3 = scmp.ne.s32.totalorder %s2432_s18, %s2428_s17  ;;  %p284_p4 = scmp.eq.s32.totalorder %s1920_s22, 1 }
   0xa   : > { %s2556_s26 = scalar_select %p265_p1, %s2436_s19, %s267_s24  }
   0xb   : > { %p2558_p5 = por %p278_p2, %p277_p0  ;;  %p2562_p6 = por %p284_p4, %p283_p3 }
   0xc   : > { %p1923_p7 = scmp.ge.s32.totalorder %s2440_s20, 1  ;;  %p340_p8 = scmp.lt.s32.totalorder %s2440_s20, 3 }
   0xe   : > { %p341_p9 = pnand %p1923_p7, %p340_p8 }
   0xf   : > { %p380_p10 = scmp.lt.s32.totalorder (!%p341_p9), %s2541_s21, 1  ;;  %s3113_s0 = sld [smem:[#allocation5_spill]] (!%p341_p9) }
  0x10   : > { %344 = sbr.rel (%p341_p9) target bundleno = 2352 (0x930), region = 64  ;;  %s2446_s12 = smov (!%p341_p9), 120  }
  0x11   : > { %s2447_s13 = smov (!%p341_p9), 80   ;;  %s2448_s15 = smov (!%p341_p9), 112  }
  0x12   : > { %s2449_s16 = smov (!%p341_p9), 72   ;;  %s2450_s22 = smov (!%p341_p9), 104  }
  0x13   : > { %s2451_s24 = smov (!%p341_p9), 64   ;;  %s2452_s25 = smov (!%p341_p9), 56  }
  0x15   : > { %s381_s29 = scalar_select %p380_p10, %s2541_s21, 1  ;;  %vm390_vm0 = vcmask 261120   ;;  %v452_v21 = vld [vmem:[%s3098_s1 + $0x18] sm:$0xff]  ;;  %v2442_v22 = vmov 0.0   ;;  %v451_v23 = vld [vmem:[%s3098_s1 + $0x10] sm:$0xff]  ;;  %vm2443_vm1 = vmmov 0  }
  0x16   : > { %2058 = vmatprep.subr.mxu1 %v2442_v22  ;;  %2066 = vmatprep.mubr.msk.f32.mxu1 %vm2443_vm1, %v2442_v22  ;;  %v450_v24 = vld [vmem:[%s3098_s1 + $0x8] sm:$0xff]  ;;  %v449_v25 = vld [vmem:[%s3098_s1] sm:$0xff]  ;;  %vm570_vm2 = vcmask 64512   ;;  %vm663_vm5 = vcmask 195584   ;;  %vm1539_vm7 = vcmask 130048  }
  0x17   : > { %s2254_s30 = smul.u32 24, %s381_s29  ;;  %2059 = vmatpush3.msra.mxu1 %v452_v21  ;;  %2090 = vmatprep.subr.mxu0 %v2442_v22  ;;  %v1925_v36 = vld [vmem:[%s3100_s3] ss:$0 sm:$0xff]  ;;  %s2444_s29 = smov 96  }
  0x18   : > { %2060 = vmatprep.subr.mxu1 %v2442_v22  ;;  %2096 = vmatprep.mubr.msk.f32.mxu0 %vm2443_vm1, %v2442_v22  ;;  %v1926_v38 = vld [vmem:[%s3101_s4] ss:$0 sm:$0xff] }
  0x19   : > { %s2573_s14 = scalar_lea.vmem %s3113_s0, %s2254_s30  ;;  %2061 = vmatpush3.msra.mxu1 %v451_v23  ;;  %v1927_v51 = vld [vmem:[%s3099_s2] ss:$0 sm:$0xff]  ;;  %s2445_s30 = smov 88  }
  0x1a   : > { %v2576_v0 = vld [vmem:[%s2573_s14] sm:$0xff]  ;;  %v387_v1 = vld [vmem:[%s2573_s14 + $0x10] sm:$0xff]  ;;  %v386_v2 = vld [vmem:[%s2573_s14 + $0x8] sm:$0xff]  ;;  %2062 = vmatprep.subr.mxu1 %v2442_v22 }
  0x1b   : > { %v391_v3 = vsel %vm390_vm0, %v2576_v0, 0.0  ;;  %v397_v4 = vsel %vm390_vm0, %v387_v1, 0.0  ;;  %v394_v5 = vsel %vm390_vm0, %v386_v2, 0.0  ;;  %2063 = vmatpush3.msra.mxu1 %v450_v24 }
  0x1c   : > { %392 = vadd.xlane.f32.xlu0 %v391_v3  ;;  %398 = vadd.xlane.f32.xlu1 %v397_v4 }
  0x1d   : > { %2064 = vmatprep.subr.mxu1 %v2442_v22 }
  0x1e   : > { %2065 = vmatpush3.msra.mxu1 %v449_v25 }
  0x1f   : > { %2075 = vmatprep.subr.mxu1 %v2442_v22 }
  0x20   : > { %395 = vadd.xlane.f32.xlu0 %v394_v5 }
  0xa5   : > { %v393_v6 = vpop.xlane.xlu0 %392  ;;  %v399_v7 = vpop.xlane.xlu1 %398 }
  0xa6   : > { %v401_v8 = vmul.f32 0.03125, %v393_v6  ;;  %v403_v9 = vmul.f32 0.03125, %v399_v7 }
  0xa8   : > { %v404_v10 = vsub.f32 %v2576_v0, %v401_v8  ;;  %v406_v11 = vsub.f32 %v387_v1, %v403_v9 }
  0xa9   : > { %v396_v12 = vpop.xlane.xlu0 %395 }
  0xaa   : > { %v402_v13 = vmul.f32 0.03125, %v396_v12  ;;  %v407_v14 = vmul.f32 %v404_v10, %v404_v10  ;;  %v409_v15 = vmul.f32 %v406_v11, %v406_v11 }
  0xac   : > { %v405_v16 = vsub.f32 %v386_v2, %v402_v13  ;;  %v410_v17 = vsel %vm390_vm0, %v407_v14, 0.0  ;;  %v416_v18 = vsel %vm390_vm0, %v409_v15, 0.0 }
  0xad   : > { %411 = vadd.xlane.f32.xlu1 %v410_v17 }
  0xae   : > { %v408_v19 = vmul.f32 %v405_v16, %v405_v16 }
  0xb0   : > { %v413_v20 = vsel %vm390_vm0, %v408_v19, 0.0 }
  0xb1   : > { %417 = vadd.xlane.f32.xlu1 %v416_v18  ;;  %414 = vadd.xlane.f32.xlu0 %v413_v20  ;;  %v549_v20 = vlaneseq }
  0xb3   : > { %v550_v21 = vshrl.u32 %v549_v20, 7  ;;  %v554_v23 = vand.u32 127, %v549_v20 }
  0xb5   : > { %vm555_vm3 = vcmp.eq.s32.totalorder %v550_v21, %v554_v23  ;;  %v551_v24 = vadd.s32 8, %v550_v21 }
  0xb6   : > { %v558_v25 = vsel %vm555_vm3, 0.17677669, %v2442_v22 }
  0xb7   : > { %vm556_vm4 = vcmp.eq.s32.totalorder %v551_v24, %v554_v23 }
 0x136   : > { %v412_v26 = vpop.xlane.xlu1 %411 }
 0x137   : > { %v419_v27 = vmul.f32 0.03125, %v412_v26  ;;  %v552_v26 = vadd.s32 16, %v550_v21 }
 0x139   : > { %v422_v28 = vadd.f32 1e-05, %v419_v27  ;;  %vm557_vm6 = vcmp.eq.s32.totalorder %v552_v26, %v554_v23 }
 0x13a   : > { %v418_v29 = vpop.xlane.xlu1 %417  ;;  %v415_v30 = vpop.xlane.xlu0 %414 }
 0x13b   : > { %2312 = vrsqrt.f32 %v422_v28  ;;  %v421_v31 = vmul.f32 0.03125, %v418_v29  ;;  %v420_v32 = vmul.f32 0.03125, %v415_v30  ;;  %v559_v30 = vsel %vm556_vm4, 0.17677669, %v2442_v22 }
 0x13d   : > { %v424_v33 = vadd.f32 1e-05, %v421_v31  ;;  %v423_v34 = vadd.f32 1e-05, %v420_v32 }
 0x13f   : > { %2314 = vrsqrt.f32 %v424_v33 }
 0x140   : > { %2316 = vrsqrt.f32 %v423_v34 }
 0x148   : > { %v2313_v35 = vpop.eup %2312 }
 0x149   : > { %v428_v37 = vmul.f32 %v2313_v35, %v404_v10  ;;  %v560_v35 = vsel %vm557_vm6, 0.17677669, %v2442_v22 }
 0x14b   : > { %v437_v39 = vmul.f32 %v1925_v36, %v428_v37 }
 0x14c   : > { %v2315_v40 = vpop.eup %2314 }
 0x14d   : > { %v2317_v41 = vpop.eup %2316  ;;  %v446_v42 = vadd.f32 %v1926_v38, %v437_v39  ;;  %v430_v44 = vmul.f32 %v2315_v40, %v406_v11 }
 0x14e   : > { %v429_v43 = vmul.f32 %v2317_v41, %v405_v16 }
 0x14f   : > { %2067 = vmatmul.mubr.msk.f32.vlgmr.msra.gmra.mxu1 %vm390_vm0, %v446_v42  ;;  %v439_v47 = vmul.f32 %v1925_v36, %v430_v44 }
 0x150   : > { %2069 = vmatprep.mubr.msk.f32.mxu1 %vm2443_vm1, %v2442_v22  ;;  %v438_v45 = vmul.f32 %v1925_v36, %v429_v43 }
 0x151   : > { %v448_v48 = vadd.f32 %v1926_v38, %v439_v47 }
 0x152   : > { %v447_v46 = vadd.f32 %v1926_v38, %v438_v45 }
 0x154   : > { %2070 = vmatmul.mubr.msk.f32.gmra.mxu1 %vm390_vm0, %v447_v46 }
 0x155   : > { %2072 = vmatprep.mubr.msk.f32.mxu1 %vm2443_vm1, %v2442_v22 }
 0x158   : > { %2073 = vmatmul.mubr.msk.f32.gmra.mxu1 %vm390_vm0, %v448_v48 }
 0x159   : > { %2081 = vmatprep.mubr.msk.f32.mxu1 %vm2443_vm1, %v2442_v22 }
 0x20f   : > { %v535_v49 = vpop.f32.mrf.mxu1 }
 0x210   : > { %v2631_v56 = vadd.f32 %v1927_v51, %v535_v49 }
 0x211   : > { %v2068_v50 = vpop.f32.mrf.mxu1 }
 0x214   : > { %v540_v52 = vpop.f32.mrf.mxu1 }
 0x215   : > { %v2628_v53 = vadd.f32 %v1927_v51, %v540_v52 }
 0x216   : > { %v2071_v54 = vpop.f32.mrf.mxu1 }
 0x217   : > { %566 = vrot.lane.b32.xlu1 %v2628_v53, %s2444_s29 }
 0x218   : > { %v545_v55 = vpop.f32.mrf.mxu1 }
 0x219   : > { %v2633_v57 = vadd.f32 %v1927_v51, %v545_v55 }
 0x21a   : > { %v2074_v58 = vpop.f32.mrf.mxu1 }
 0x21b   : > { %564 = vrot.lane.b32.xlu1 %v2631_v56, %s2444_s29  ;;  %568 = vrot.lane.b32.xlu0 %v2633_v57, %s2444_s29  ;;  %s2453_s29 = smov 48  }
 0x21f   : > { %805 = vrot.lane.b32.xlu1 %v2633_v57, %s2445_s30  ;;  %803 = vrot.lane.b32.xlu0 %v2628_v53, %s2445_s30 }
 0x223   : > { %801 = vrot.lane.b32.xlu1 %v2631_v56, %s2445_s30  ;;  %795 = vrot.lane.b32.xlu0 %v2631_v56, %s2446_s12  ;;  %s2454_s30 = smov 40  }
 0x227   : > { %1040 = vrot.lane.b32.xlu1 %v2633_v57, %s2447_s13  ;;  %797 = vrot.lane.b32.xlu0 %v2628_v53, %s2446_s12 }
 0x22b   : > { %1038 = vrot.lane.b32.xlu1 %v2628_v53, %s2447_s13  ;;  %799 = vrot.lane.b32.xlu0 %v2633_v57, %s2446_s12  ;;  %s3109_s12 = smov 8  }
 0x22f   : > { %1036 = vrot.lane.b32.xlu1 %v2631_v56, %s2447_s13  ;;  %1030 = vrot.lane.b32.xlu0 %v2631_v56, %s2448_s15  ;;  %s2456_s13 = smov 16  }
 0x233   : > { %1275 = vrot.lane.b32.xlu1 %v2633_v57, %s2449_s16  ;;  %1032 = vrot.lane.b32.xlu0 %v2628_v53, %s2448_s15 }
 0x237   : > { %1273 = vrot.lane.b32.xlu1 %v2628_v53, %s2449_s16  ;;  %1034 = vrot.lane.b32.xlu0 %v2633_v57, %s2448_s15  ;;  %s2457_s15 = smov 24  }
 0x23b   : > { %1271 = vrot.lane.b32.xlu1 %v2631_v56, %s2449_s16  ;;  %1265 = vrot.lane.b32.xlu0 %v2631_v56, %s2450_s22  ;;  %s377_s16 = sand.u32 1, %s2432_s18  }
 0x23f   : > { %1267 = vrot.lane.b32.xlu1 %v2628_v53, %s2450_s22  ;;  %1269 = vrot.lane.b32.xlu0 %v2633_v57, %s2450_s22  ;;  %s2253_s22 = smul.u32 24, %s377_s16 }
 0x243   : > { %697 = vrot.lane.b32.xlu1 %v2631_v56, %s2451_s24  ;;  %699 = vrot.lane.b32.xlu0 %v2628_v53, %s2451_s24 }
 0x247   : > { %701 = vrot.lane.b32.xlu1 %v2633_v57, %s2451_s24 }
 0x24b   : > { %936 = vrot.lane.b32.xlu1 %v2633_v57, %s2452_s25 }
 0x289   : > { %v567_v59 = vpop.permute.xlu1 %566 }
 0x28d   : > { %v565_v60 = vpop.permute.xlu1 %564  ;;  %v569_v61 = vpop.permute.xlu0 %568 }
 0x28e   : > { %2076 = vmatpush3.xpose.msk.msra.mxu1 %vm570_vm2, %v569_v61 }
 0x28f   : > { %2077 = vmatprep.subr.mxu1 %v2442_v22 }
 0x291   : > { %v806_v62 = vpop.permute.xlu1 %805  ;;  %v804_v63 = vpop.permute.xlu0 %803 }
 0x292   : > { %2078 = vmatpush3.xpose.msk.msra.mxu1 %vm570_vm2, %v567_v59 }
 0x293   : > { %2079 = vmatprep.subr.mxu1 %v2442_v22 }
 0x295   : > { %v802_v1 = vpop.permute.xlu1 %801  ;;  %v796_v2 = vpop.permute.xlu0 %795 }
 0x296   : > { %2080 = vmatpush3.xpose.msk.msra.mxu1 %vm570_vm2, %v565_v60 }
 0x297   : > { %2105 = vmatprep.subr.mxu1 %v2442_v22 }
 0x299   : > { %v1041_v3 = vpop.permute.xlu1 %1040  ;;  %2082 = vmatmul.mubr.msk.f32.vlgmr.msra.gmra.mxu1 %vm570_vm2, %v2631_v56  ;;  %v798_v4 = vpop.permute.xlu0 %797 }
 0x29a   : > { %2106 = vmatpush3.xpose.msk.msra.mxu1 %vm570_vm2, %v806_v62  ;;  %2084 = vmatprep.mubr.msk.f32.mxu1 %vm2443_vm1, %v2442_v22 }
 0x29b   : > { %2107 = vmatprep.subr.mxu1 %v2442_v22 }
 0x29d   : > { %v1039_v5 = vpop.permute.xlu1 %1038  ;;  %2085 = vmatmul.mubr.msk.f32.gmra.mxu1 %vm570_vm2, %v2628_v53  ;;  %v800_v6 = vpop.permute.xlu0 %799 }
 0x29e   : > { %2108 = vmatpush3.xpose.msk.msra.mxu1 %vm570_vm2, %v804_v63  ;;  %2087 = vmatprep.mubr.msk.f32.mxu1 %vm2443_vm1, %v2442_v22 }
 0x29f   : > { %2109 = vmatprep.subr.mxu1 %v2442_v22 }
 0x2a1   : > { %v1037_v7 = vpop.permute.xlu1 %1036  ;;  %2088 = vmatmul.mubr.msk.f32.gmra.mxu1 %vm570_vm2, %v2633_v57  ;;  %v1031_v8 = vpop.permute.xlu0 %1030 }
 0x2a2   : > { %2110 = vmatpush3.xpose.msk.msra.mxu1 %vm570_vm2, %v802_v1  ;;  %2111 = vmatprep.mubr.msk.f32.mxu1 %vm2443_vm1, %v2442_v22 }
 0x2a3   : > { %2135 = vmatprep.subr.mxu1 %v2442_v22 }
 0x2a5   : > { %v1276_v9 = vpop.permute.xlu1 %1275  ;;  %2112 = vmatmul.mubr.msk.f32.vlgmr.msra.gmra.mxu1 %vm570_vm2, %v796_v2  ;;  %v1033_v10 = vpop.permute.xlu0 %1032 }
 0x2a6   : > { %2136 = vmatpush3.xpose.msk.msra.mxu1 %vm570_vm2, %v1041_v3  ;;  %2114 = vmatprep.mubr.msk.f32.mxu1 %vm2443_vm1, %v2442_v22 }
 0x2a7   : > { %2137 = vmatprep.subr.mxu1 %v2442_v22 }
 0x2a9   : > { %v1274_v11 = vpop.permute.xlu1 %1273  ;;  %2115 = vmatmul.mubr.msk.f32.gmra.mxu1 %vm570_vm2, %v798_v4  ;;  %v1035_v12 = vpop.permute.xlu0 %1034 }
 0x2aa   : > { %2138 = vmatpush3.xpose.msk.msra.mxu1 %vm570_vm2, %v1039_v5  ;;  %2117 = vmatprep.mubr.msk.f32.mxu1 %vm2443_vm1, %v2442_v22 }
 0x2ab   : > { %2139 = vmatprep.subr.mxu1 %v2442_v22 }
 0x2ad   : > { %v1272_v13 = vpop.permute.xlu1 %1271  ;;  %2118 = vmatmul.mubr.msk.f32.gmra.mxu1 %vm570_vm2, %v800_v6  ;;  %v1266_v14 = vpop.permute.xlu0 %1265 }
 0x2ae   : > { %2140 = vmatpush3.xpose.msk.msra.mxu1 %vm570_vm2, %v1037_v7  ;;  %2141 = vmatprep.mubr.msk.f32.mxu1 %vm2443_vm1, %v2442_v22 }
 0x2af   : > { %2165 = vmatprep.subr.mxu1 %v2442_v22 }
 0x2b1   : > { %v1268_v15 = vpop.permute.xlu1 %1267  ;;  %2142 = vmatmul.mubr.msk.f32.vlgmr.msra.gmra.mxu1 %vm570_vm2, %v1031_v8  ;;  %v1270_v16 = vpop.permute.xlu0 %1269 }
 0x2b2   : > { %2166 = vmatpush3.xpose.msk.msra.mxu1 %vm570_vm2, %v1276_v9  ;;  %2144 = vmatprep.mubr.msk.f32.mxu1 %vm2443_vm1, %v2442_v22 }
 0x2b3   : > { %2167 = vmatprep.subr.mxu1 %v2442_v22 }
 0x2b5   : > { %v698_v17 = vpop.permute.xlu1 %697  ;;  %2145 = vmatmul.mubr.msk.f32.gmra.mxu1 %vm570_vm2, %v1033_v10  ;;  %v700_v19 = vpop.permute.xlu0 %699 }
 0x2b6   : > { %2168 = vmatpush3.xpose.msk.msra.mxu1 %vm570_vm2, %v1274_v11  ;;  %2147 = vmatprep.mubr.msk.f32.mxu1 %vm2443_vm1, %v2442_v22 }
 0x2b7   : > { %2169 = vmatprep.subr.mxu1 %v2442_v22 }
 0x2b9   : > { %v702_v18 = vpop.permute.xlu1 %701  ;;  %2148 = vmatmul.mubr.msk.f32.gmra.mxu1 %vm570_vm2, %v1035_v12 }
 0x2ba   : > { %2091 = vmatpush3.msra.mxu0 %v702_v18  ;;  %2170 = vmatpush3.xpose.msk.msra.mxu1 %vm570_vm2, %v1272_v13 }
 0x2bb   : > { %2092 = vmatprep.subr.mxu0 %v2442_v22  ;;  %2171 = vmatprep.mubr.msk.f32.mxu1 %vm2443_vm1, %v2442_v22 }
 0x2bc   : > { %2093 = vmatpush3.msra.mxu0 %v700_v19  ;;  %2195 = vmatprep.subr.mxu1 %v2442_v22 }
 0x2bd   : > { %2094 = vmatprep.subr.mxu0 %v2442_v22  ;;  %2172 = vmatmul.mubr.msk.f32.vlgmr.msra.gmra.mxu1 %vm570_vm2, %v1266_v14 }
 0x2be   : > { %2095 = vmatpush3.msra.mxu0 %v698_v17  ;;  %2174 = vmatprep.mubr.msk.f32.mxu1 %vm2443_vm1, %v2442_v22  ;;  %v2782_v17 = vpop.permute.xlu1 %936 }
 0x2bf   : > { %2120 = vmatprep.subr.mxu0 %v2442_v22 }
 0x2c1   : > { %2175 = vmatmul.mubr.msk.f32.gmra.mxu1 %vm570_vm2, %v1268_v15 }
 0x2c2   : > { %2177 = vmatprep.mubr.msk.f32.mxu1 %vm2443_vm1, %v2442_v22 }
 0x2c5   : > { %2178 = vmatmul.mubr.msk.f32.gmra.mxu1 %vm570_vm2, %v1270_v16 }
 0x2c6   : > { %2203 = vmatprep.mubr.msk.f32.mxu1 %vm2443_vm1, %v2442_v22 }
 0x359   : > { %v649_v27 = vpop.f32.mrf.mxu1 }
 0x35a   : > { %v2727_v28 = vadd.f32 %v649_v27, %v558_v25 }
 0x35b   : > { %v2083_v29 = vpop.f32.mrf.mxu1 }
 0x35c   : > { %v664_v31 = vsel %vm663_vm5, %v2727_v28, -inf }
 0x35d   : > { %665 = vmax.xlane.f32.xlu1 %v664_v31  ;;  %v654_v32 = vpop.f32.mrf.mxu1 }
 0x35e   : > { %v2732_v33 = vadd.f32 %v654_v32, %v559_v30 }
 0x35f   : > { %v2086_v34 = vpop.f32.mrf.mxu1 }
 0x360   : > { %v667_v36 = vsel %vm663_vm5, %v2732_v33, -inf }
 0x361   : > { %668 = vmax.xlane.f32.xlu0 %v667_v36  ;;  %v659_v37 = vpop.f32.mrf.mxu1 }
 0x362   : > { %v2737_v38 = vadd.f32 %v659_v37, %v560_v35 }
 0x363   : > { %v2089_v39 = vpop.f32.mrf.mxu1 }
 0x364   : > { %v670_v40 = vsel %vm663_vm5, %v2737_v38, -inf }
 0x365   : > { %671 = vmax.xlane.f32.xlu0 %v670_v40  ;;  %v885_v41 = vpop.f32.mrf.mxu1 }
 0x366   : > { %v2741_v42 = vadd.f32 %v885_v41, %v558_v25 }
 0x367   : > { %v2113_v43 = vpop.f32.mrf.mxu1 }
 0x368   : > { %v899_v44 = vsel %vm663_vm5, %v2741_v42, -inf }
 0x369   : > { %900 = vmax.xlane.f32.xlu0 %v899_v44  ;;  %v890_v45 = vpop.f32.mrf.mxu1 }
 0x36a   : > { %v2745_v46 = vadd.f32 %v890_v45, %v559_v30 }
 0x36b   : > { %v2116_v47 = vpop.f32.mrf.mxu1 }
 0x36c   : > { %v902_v48 = vsel %vm663_vm5, %v2745_v46, -inf }
 0x36d   : > { %903 = vmax.xlane.f32.xlu1 %v902_v48  ;;  %v895_v49 = vpop.f32.mrf.mxu1 }
 0x36e   : > { %v2749_v50 = vadd.f32 %v895_v49, %v560_v35 }
 0x36f   : > { %v2119_v51 = vpop.f32.mrf.mxu1 }
 0x370   : > { %v905_v52 = vsel %vm663_vm5, %v2749_v50, -inf }
 0x371   : > { %906 = vmax.xlane.f32.xlu0 %v905_v52  ;;  %v1120_v54 = vpop.f32.mrf.mxu1 }
 0x372   : > { %v2753_v55 = vadd.f32 %v1120_v54, %v558_v25 }
 0x373   : > { %v2143_v58 = vpop.f32.mrf.mxu1 }
 0x374   : > { %v1134_v59 = vsel %vm663_vm5, %v2753_v55, -inf }
 0x375   : > { %1135 = vmax.xlane.f32.xlu1 %v1134_v59  ;;  %v1125_v60 = vpop.f32.mrf.mxu1 }
 0x376   : > { %v2757_v61 = vadd.f32 %v1125_v60, %v559_v30 }
 0x377   : > { %v2146_v62 = vpop.f32.mrf.mxu1 }
 0x378   : > { %v1137_v63 = vsel %vm663_vm5, %v2757_v61, -inf }
 0x379   : > { %1138 = vmax.xlane.f32.xlu0 %v1137_v63  ;;  %v1130_v1 = vpop.f32.mrf.mxu1 }
 0x37a   : > { %v2761_v2 = vadd.f32 %v1130_v1, %v560_v35 }
 0x37b   : > { %v2149_v3 = vpop.f32.mrf.mxu1 }
 0x37c   : > { %v1140_v4 = vsel %vm663_vm5, %v2761_v2, -inf }
 0x37d   : > { %1141 = vmax.xlane.f32.xlu1 %v1140_v4  ;;  %v1355_v5 = vpop.f32.mrf.mxu1 }
 0x37e   : > { %v2765_v6 = vadd.f32 %v1355_v5, %v558_v25 }
 0x37f   : > { %v2173_v7 = vpop.f32.mrf.mxu1 }
 0x380   : > { %v1369_v8 = vsel %vm663_vm5, %v2765_v6, -inf }
 0x381   : > { %1370 = vmax.xlane.f32.xlu0 %v1369_v8  ;;  %v1360_v9 = vpop.f32.mrf.mxu1 }
 0x382   : > { %v2774_v13 = vadd.f32 %v1360_v9, %v559_v30 }
 0x383   : > { %v2176_v10 = vpop.f32.mrf.mxu1 }
 0x384   : > { %v1372_v15 = vsel %vm663_vm5, %v2774_v13, -inf }
 0x385   : > { %v1365_v11 = vpop.f32.mrf.mxu1 }
 0x386   : > { %v2776_v14 = vadd.f32 %v1365_v11, %v560_v35 }
 0x387   : > { %v2179_v12 = vpop.f32.mrf.mxu1 }
 0x388   : > { %v1375_v16 = vsel %vm663_vm5, %v2776_v14, -inf }
 0x38e   : > { %932 = vrot.lane.b32.xlu1 %v2631_v56, %s2452_s25 }
 0x392   : > { %1171 = vrot.lane.b32.xlu1 %v2633_v57, %s2453_s29 }
 0x397   : > { %934 = vrot.lane.b32.xlu0 %v2628_v53, %s2452_s25  ;;  %s2458_s25 = smov [#allocation2]  }
 0x3b6   : > { %1373 = vmax.xlane.f32.xlu1 %v1372_v15  ;;  %1376 = vmax.xlane.f32.xlu0 %v1375_v16 }
 0x3e6   : > { %v666_v18 = vpop.xlane.xlu1 %665 }
 0x3e7   : > { %v673_v19 = vsub.f32 %v2727_v28, %v666_v18 }
 0x3e9   : > { %v676_v20 = vmul.f32 1.442695, %v673_v19 }
 0x3ea   : > { %v669_v21 = vpop.xlane.xlu0 %668 }
 0x3eb   : > { %2318 = vpow2.f32 %v676_v20  ;;  %v674_v23 = vsub.f32 %v2732_v33, %v669_v21 }
 0x3ed   : > { %v678_v24 = vmul.f32 1.442695, %v674_v23 }
 0x3ee   : > { %v672_v28 = vpop.xlane.xlu0 %671 }
 0x3ef   : > { %2320 = vpow2.f32 %v678_v24  ;;  %v675_v30 = vsub.f32 %v2737_v38, %v672_v28 }
 0x3f1   : > { %v680_v34 = vmul.f32 1.442695, %v675_v30 }
 0x3f2   : > { %v901_v31 = vpop.xlane.xlu0 %900 }
 0x3f3   : > { %v908_v33 = vsub.f32 %v2741_v42, %v901_v31  ;;  %2322 = vpow2.f32 %v680_v34 }
 0x3f5   : > { %v911_v37 = vmul.f32 1.442695, %v908_v33 }
 0x3f6   : > { %v904_v32 = vpop.xlane.xlu1 %903 }
 0x3f7   : > { %v909_v35 = vsub.f32 %v2745_v46, %v904_v32  ;;  %2324 = vpow2.f32 %v911_v37 }
 0x3f8   : > { %v2786_v25 = vpop.eup %2318 }
 0x3f9   : > { %v682_v26 = vsel %vm663_vm5, %v2786_v25, 0.0  ;;  %v913_v39 = vmul.f32 1.442695, %v909_v35 }
 0x3fa   : > { %683 = vadd.xlane.f32.xlu1 %v682_v26  ;;  %v907_v36 = vpop.xlane.xlu0 %906 }
 0x3fb   : > { %v910_v40 = vsub.f32 %v2749_v50, %v907_v36  ;;  %2326 = vpow2.f32 %v913_v39 }
 0x3fc   : > { %v2790_v27 = vpop.eup %2320 }
 0x3fd   : > { %v685_v29 = vsel %vm663_vm5, %v2790_v27, 0.0  ;;  %v915_v43 = vmul.f32 1.442695, %v910_v40 }
 0x3fe   : > { %686 = vadd.xlane.f32.xlu0 %v685_v29  ;;  %v1136_v41 = vpop.xlane.xlu1 %1135 }
 0x3ff   : > { %v1143_v44 = vsub.f32 %v2753_v55, %v1136_v41  ;;  %2328 = vpow2.f32 %v915_v43 }
 0x400   : > { %v2803_v51 = vpop.eup %2322 }
 0x401   : > { %v1146_v47 = vmul.f32 1.442695, %v1143_v44  ;;  %v688_v54 = vsel %vm663_vm5, %v2803_v51, 0.0 }
 0x402   : > { %v1139_v38 = vpop.xlane.xlu0 %1138 }
 0x403   : > { %2330 = vpow2.f32 %v1146_v47  ;;  %v1144_v12 = vsub.f32 %v2757_v61, %v1139_v38 }
 0x404   : > { %v2805_v50 = vpop.eup %2324 }
 0x405   : > { %v917_v59 = vsel %vm663_vm5, %v2805_v50, 0.0  ;;  %v1148_v18 = vmul.f32 1.442695, %v1144_v12 }
 0x406   : > { %v1142_v45 = vpop.xlane.xlu1 %1141 }
 0x407   : > { %v1145_v42 = vsub.f32 %v2761_v2, %v1142_v45 }
 0x408   : > { %v2809_v55 = vpop.eup %2326 }
 0x409   : > { %v1150_v46 = vmul.f32 1.442695, %v1145_v42  ;;  %v920_v58 = vsel %vm663_vm5, %v2809_v55, 0.0 }
 0x40a   : > { %v1371_v48 = vpop.xlane.xlu0 %1370  ;;  %v933_v10 = vpop.permute.xlu1 %932 }
 0x40b   : > { %1167 = vrot.lane.b32.xlu1 %v2631_v56, %s2453_s29  ;;  %v1378_v49 = vsub.f32 %v2765_v6, %v1371_v48  ;;  %2332 = vpow2.f32 %v1150_v46 }
 0x40c   : > { %v2815_v60 = vpop.eup %2328 }
 0x40d   : > { %v1381_v52 = vmul.f32 1.442695, %v1378_v49  ;;  %v923_v62 = vsel %vm663_vm5, %v2815_v60, 0.0 }
 0x40e   : > { %v935_v3 = vpop.permute.xlu0 %934  ;;  %v1172_v11 = vpop.permute.xlu1 %1171 }
 0x40f   : > { %2334 = vpow2.f32 %v1381_v52 }
 0x410   : > { %v2819_v63 = vpop.eup %2330 }
 0x411   : > { %v1152_v1 = vsel %vm663_vm5, %v2819_v63, 0.0 }
 0x414   : > { %1169 = vrot.lane.b32.xlu0 %v2628_v53, %s2453_s29  ;;  %s379_s29 = scalar_lea.vmem [#allocation2], %s2253_s22 }
 0x418   : > { %v2823_v2 = vpop.eup %2332 }
 0x419   : > { %v1158_v4 = vsel %vm663_vm5, %v2823_v2, 0.0 }
 0x41c   : > { %v2827_v5 = vpop.eup %2334 }
 0x41d   : > { %v1387_v9 = vsel %vm663_vm5, %v2827_v5, 0.0 }
 0x42f   : > { %689 = vadd.xlane.f32.xlu1 %v688_v54 }
 0x433   : > { %921 = vadd.xlane.f32.xlu1 %v920_v58  ;;  %918 = vadd.xlane.f32.xlu0 %v917_v59 }
 0x437   : > { %924 = vadd.xlane.f32.xlu0 %v923_v62 }
 0x43b   : > { %1153 = vadd.xlane.f32.xlu0 %v1152_v1 }
 0x43f   : > { %1159 = vadd.xlane.f32.xlu0 %v1158_v4  ;;  %v1377_v6 = vpop.xlane.xlu0 %1376  ;;  %v1374_v15 = vpop.xlane.xlu1 %1373 }
 0x440   : > { %v1380_v7 = vsub.f32 %v2776_v14, %v1377_v6  ;;  %v1379_v19 = vsub.f32 %v2774_v13, %v1374_v15 }
 0x442   : > { %v1385_v8 = vmul.f32 1.442695, %v1380_v7  ;;  %v1383_v20 = vmul.f32 1.442695, %v1379_v19 }
 0x443   : > { %1388 = vadd.xlane.f32.xlu0 %v1387_v9 }
 0x444   : > { %1406 = vrot.lane.b32.xlu1 %v2633_v57, %s2454_s30  ;;  %2336 = vpow2.f32 %v1385_v8 }
 0x445   : > { %2338 = vpow2.f32 %v1148_v18 }
 0x446   : > { %2340 = vpow2.f32 %v1383_v20 }
 0x451   : > { %v2834_v16 = vpop.eup %2336 }
 0x452   : > { %v1393_v14 = vsel %vm663_vm5, %v2834_v16, 0.0  ;;  %v2839_v21 = vpop.eup %2338 }
 0x453   : > { %1394 = vadd.xlane.f32.xlu0 %v1393_v14  ;;  %v1155_v57 = vsel %vm663_vm5, %v2839_v21, 0.0  ;;  %v2843_v23 = vpop.eup %2340 }
 0x454   : > { %v1390_v61 = vsel %vm663_vm5, %v2843_v23, 0.0 }
 0x468   : > { %1156 = vadd.xlane.f32.xlu1 %v1155_v57 }
 0x469   : > { %1402 = vrot.lane.b32.xlu0 %v2631_v56, %s2454_s30 }
 0x46c   : > { %1391 = vadd.xlane.f32.xlu1 %v1390_v61 }
 0x47d   : > { %1404 = vrot.lane.b32.xlu1 %v2628_v53, %s2454_s30  ;;  %s1858_s30 = sshll.u32 %s379_s29, 4  ;;  %s3047_s30 = int_to_ptr.vmem [resolvable:$true] %s1858_s30 }
 0x47e   : > { %s2380_s24 = scalar_lea.vmem %s3047_s30, 384 }
 0x47f   : > { %p2381_p11 = scmp.ne.s32.totalorder %s3047_s30, %s2380_s24 }
 0x481   : > { %p2382_p12 = pnand %p2381_p11, %p2558_p5 }
 0x483   : > { %v684_v13 = vpop.xlane.xlu1 %683  ;;  %p2383_p13 = pneg %p2382_p12 }
 0x484   : > { %2342 = vrcp.f32 %v684_v13 }
 0x487   : > { %v687_v24 = vpop.xlane.xlu0 %686  ;;  %v1168_v53 = vpop.permute.xlu1 %1167 }
 0x488   : > { %2344 = vrcp.f32 %v687_v24 }
 0x491   : > { %v2343_v26 = vpop.eup %2342 }
 0x492   : > { %v694_v29 = vmul.f32 %v2343_v26, %v2786_v25 }
 0x494   : > { %2097 = vmatmul.mubr.msk.f32.vlgmr.msra.gmra.mxu0 %vm663_vm5, %v694_v29 }
 0x495   : > { %v2345_v28 = vpop.eup %2344  ;;  %2121 = vmatpush3.msra.mxu0 %v2782_v17  ;;  %2099 = vmatprep.mubr.msk.f32.mxu0 %vm2443_vm1, %v2442_v22  ;;  %v1170_v17 = vpop.permute.xlu0 %1169 }
 0x496   : > { %2122 = vmatprep.subr.mxu0 %v2442_v22  ;;  %v695_v56 = vmul.f32 %v2345_v28, %v2790_v27 }
 0x497   : > { %2123 = vmatpush3.msra.mxu0 %v935_v3 }
 0x498   : > { %2124 = vmatprep.subr.mxu0 %v2442_v22  ;;  %2100 = vmatmul.mubr.msk.f32.gmra.mxu0 %vm663_vm5, %v695_v56 }
 0x499   : > { %2125 = vmatpush3.msra.mxu0 %v933_v10  ;;  %2102 = vmatprep.mubr.msk.f32.mxu0 %vm2443_vm1, %v2442_v22 }
 0x49a   : > { %2150 = vmatprep.subr.mxu0 %v2442_v22 }
 0x4b8   : > { %v690_v25 = vpop.xlane.xlu1 %689 }
 0x4b9   : > { %2346 = vrcp.f32 %v690_v25 }
 0x4bc   : > { %v919_v30 = vpop.xlane.xlu0 %918  ;;  %v922_v31 = vpop.xlane.xlu1 %921 }
 0x4bd   : > { %2348 = vrcp.f32 %v919_v30 }
 0x4be   : > { %2350 = vrcp.f32 %v922_v31 }
 0x4c0   : > { %v925_v27 = vpop.xlane.xlu0 %924  ;;  %v1407_v38 = vpop.permute.xlu1 %1406 }
 0x4c1   : > { %2352 = vrcp.f32 %v925_v27 }
 0x4c4   : > { %v1154_v32 = vpop.xlane.xlu0 %1153 }
 0x4c5   : > { %2354 = vrcp.f32 %v1154_v32 }
 0x4c6   : > { %v2347_v33 = vpop.eup %2346 }
 0x4c7   : > { %v696_v34 = vmul.f32 %v2347_v33, %v2803_v51 }
 0x4c8   : > { %v1160_v45 = vpop.xlane.xlu0 %1159 }
 0x4c9   : > { %2103 = vmatmul.mubr.msk.f32.gmra.mxu0 %vm663_vm5, %v696_v34 }
 0x4ca   : > { %2126 = vmatprep.mubr.msk.f32.mxu0 %vm2443_vm1, %v2442_v22  ;;  %v2349_v35 = vpop.eup %2348 }
 0x4cb   : > { %v929_v36 = vmul.f32 %v2349_v35, %v2805_v50  ;;  %v2351_v37 = vpop.eup %2350 }
 0x4cc   : > { %v930_v39 = vmul.f32 %v2351_v37, %v2809_v55  ;;  %v1389_v47 = vpop.xlane.xlu0 %1388 }
 0x4cd   : > { %2127 = vmatmul.mubr.msk.f32.vlgmr.msra.gmra.mxu0 %vm663_vm5, %v929_v36 }
 0x4ce   : > { %2151 = vmatpush3.msra.mxu0 %v1172_v11  ;;  %2129 = vmatprep.mubr.msk.f32.mxu0 %vm2443_vm1, %v2442_v22  ;;  %v2353_v40 = vpop.eup %2352 }
 0x4cf   : > { %2152 = vmatprep.subr.mxu0 %v2442_v22  ;;  %v931_v41 = vmul.f32 %v2353_v40, %v2815_v60 }
 0x4d0   : > { %2153 = vmatpush3.msra.mxu0 %v1170_v17 }
 0x4d1   : > { %2154 = vmatprep.subr.mxu0 %v2442_v22  ;;  %2130 = vmatmul.mubr.msk.f32.gmra.mxu0 %vm663_vm5, %v930_v39  ;;  %v2378_v39 = vld [vmem:[%s2573_s14 + $0x8] sm:$0xff] }
 0x4d2   : > { %2155 = vmatpush3.msra.mxu0 %v1168_v53  ;;  %2132 = vmatprep.mubr.msk.f32.mxu0 %vm2443_vm1, %v2442_v22  ;;  %v2355_v43 = vpop.eup %2354 }
 0x4d3   : > { %2180 = vmatprep.subr.mxu0 %v2442_v22  ;;  %v1164_v44 = vmul.f32 %v2355_v43, %v2819_v63 }
 0x4d5   : > { %2133 = vmatmul.mubr.msk.f32.gmra.mxu0 %vm663_vm5, %v931_v41 }
 0x4d6   : > { %2156 = vmatprep.mubr.msk.f32.mxu0 %vm2443_vm1, %v2442_v22 }
 0x4d9   : > { %2157 = vmatmul.mubr.msk.f32.vlgmr.msra.gmra.mxu0 %vm663_vm5, %v1164_v44 }
 0x4da   : > { %2181 = vmatpush3.msra.mxu0 %v1407_v38  ;;  %2159 = vmatprep.mubr.msk.f32.mxu0 %vm2443_vm1, %v2442_v22 }
 0x4db   : > { %2182 = vmatprep.subr.mxu0 %v2442_v22 }
 0x4dc   : > { %v1395_v48 = vpop.xlane.xlu0 %1394 }
 0x4e0   : > { %v1403_v51 = vpop.permute.xlu0 %1402 }
 0x4f1   : > { %v1157_v42 = vpop.xlane.xlu1 %1156 }
 0x4f2   : > { %2356 = vrcp.f32 %v1157_v42 }
 0x4f3   : > { %2358 = vrcp.f32 %v1160_v45 }
 0x4f4   : > { %2360 = vrcp.f32 %v1389_v47  ;;  %v2379_v47 = vld [vmem:[%s2573_s14 + $0x10] sm:$0xff] }
 0x4f5   : > { %v1392_v46 = vpop.xlane.xlu1 %1391 }
 0x4f6   : > { %2362 = vrcp.f32 %v1392_v46 }
 0x4f7   : > { %2364 = vrcp.f32 %v1395_v48 }
 0x4f9   : > { %v1405_v49 = vpop.permute.xlu1 %1404 }
 0x4fa   : > { %2183 = vmatpush3.msra.mxu0 %v1405_v49 }
 0x4fb   : > { %2184 = vmatprep.subr.mxu0 %v2442_v22 }
 0x4fc   : > { %2185 = vmatpush3.msra.mxu0 %v1403_v51 }
 0x4fd   : > { %2212 = vmatprep.subr.mxu0 %v2442_v22 }
 0x4ff   : > { %v2357_v50 = vpop.eup %2356 }
 0x500   : > { %v1165_v52 = vmul.f32 %v2357_v50, %v2839_v21  ;;  %v2359_v54 = vpop.eup %2358 }
 0x501   : > { %v1166_v55 = vmul.f32 %v2359_v54, %v2823_v2  ;;  %v2361_v58 = vpop.eup %2360 }
 0x502   : > { %2160 = vmatmul.mubr.msk.f32.gmra.mxu0 %vm663_vm5, %v1165_v52  ;;  %v1399_v59 = vmul.f32 %v2361_v58, %v2827_v5 }
 0x503   : > { %2162 = vmatprep.mubr.msk.f32.mxu0 %vm2443_vm1, %v2442_v22  ;;  %v2363_v60 = vpop.eup %2362 }
 0x504   : > { %v1400_v62 = vmul.f32 %v2363_v60, %v2843_v23  ;;  %v2365_v63 = vpop.eup %2364 }
 0x505   : > { %v1401_v1 = vmul.f32 %v2365_v63, %v2834_v16 }
 0x506   : > { %2163 = vmatmul.mubr.msk.f32.gmra.mxu0 %vm663_vm5, %v1166_v55 }
 0x507   : > { %2186 = vmatprep.mubr.msk.f32.mxu0 %vm2443_vm1, %v2442_v22 }
 0x50a   : > { %2187 = vmatmul.mubr.msk.f32.vlgmr.msra.gmra.mxu0 %vm663_vm5, %v1399_v59 }
 0x50b   : > { %2189 = vmatprep.mubr.msk.f32.mxu0 %vm2443_vm1, %v2442_v22 }
 0x50e   : > { %2190 = vmatmul.mubr.msk.f32.gmra.mxu0 %vm663_vm5, %v1400_v62 }
 0x50f   : > { %2192 = vmatprep.mubr.msk.f32.mxu0 %vm2443_vm1, %v2442_v22 }
 0x512   : > { %2193 = vmatmul.mubr.msk.f32.gmra.mxu0 %vm663_vm5, %v1401_v1 }
 0x513   : > { %2244 = vmatprep.mubr.msk.f32.mxu0 %vm2443_vm1, %v2442_v22 }
 0x554   : > { %v781_v2 = vpop.f32.mrf.mxu0 }
 0x556   : > { %v2098_v3 = vpop.f32.mrf.mxu0 }
 0x558   : > { %v786_v4 = vpop.f32.mrf.mxu0 }
 0x55a   : > { %v2101_v5 = vpop.f32.mrf.mxu0 }
 0x55b   : > { %v1610_v5 = vld [vmem:[%s3104_s7 + $0x10] sm:$0xff] }
 0x589   : > { %v791_v6 = vpop.f32.mrf.mxu0 }
 0x58b   : > { %v2104_v7 = vpop.f32.mrf.mxu0 }
 0x58c   : > { %v1608_v7 = vld [vmem:[%s3104_s7] sm:$0xff] }
 0x58d   : > { %v1016_v8 = vpop.f32.mrf.mxu0 }
 0x58e   : > { %1503 = vrot.lane.b32.xlu1 %v1016_v8, %s3109_s12 }
 0x58f   : > { %v2128_v9 = vpop.f32.mrf.mxu0 }
 0x591   : > { %v1021_v10 = vpop.f32.mrf.mxu0 }
 0x592   : > { %1505 = vrot.lane.b32.xlu0 %v1021_v10, %s3109_s12 }
 0x593   : > { %v2131_v11 = vpop.f32.mrf.mxu0 }
 0x595   : > { %v1026_v12 = vpop.f32.mrf.mxu0 }
 0x597   : > { %v2134_v15 = vpop.f32.mrf.mxu0 }
 0x599   : > { %v1251_v16 = vpop.f32.mrf.mxu0 }
 0x59a   : > { %1515 = vrot.lane.b32.xlu0 %v1251_v16, %s2456_s13 }
 0x59b   : > { %v2158_v18 = vpop.f32.mrf.mxu0 }
 0x5c2   : > { %v1256_v19 = vpop.f32.mrf.mxu0 }
 0x5c3   : > { %1517 = vrot.lane.b32.xlu1 %v1256_v19, %s2456_s13 }
 0x5c4   : > { %v2161_v14 = vpop.f32.mrf.mxu0 }
 0x5c6   : > { %v1261_v20 = vpop.f32.mrf.mxu0 }
 0x5c8   : > { %v2164_v21 = vpop.f32.mrf.mxu0 }
 0x5ca   : > { %v1486_v57 = vpop.f32.mrf.mxu0 }
 0x5cb   : > { %1527 = vrot.lane.b32.xlu1 %v1486_v57, %s2457_s15  ;;  %v1968_v57 = vld [vmem:[%s3103_s6] ss:$0 sm:$0xff] }
 0x5cc   : > { %v2188_v23 = vpop.f32.mrf.mxu0 }
 0x5ce   : > { %v1491_v61 = vpop.f32.mrf.mxu0 }
 0x5cf   : > { %1507 = vrot.lane.b32.xlu1 %v1026_v12, %s3109_s12  ;;  %1529 = vrot.lane.b32.xlu0 %v1491_v61, %s2457_s15  ;;  %s2384_s12 = sshll.u32 %s2458_s25, 4  ;;  %s2385_s12 = int_to_ptr.vmem [resolvable:$false] %s2384_s12 }
 0x5d0   : > { %v2191_v13 = vpop.f32.mrf.mxu0  ;;  %s2386_s0 = scalar_lea.vmem %s2385_s12, 768  ;;  %p2387_p0 = scmp.lt.s32.totalorder %s3047_s30, %s2385_s12 }
 0x5d1   : > { %p2388_p1 = scmp.lt.s32.totalorder %s2386_s0, %s2380_s24 }
 0x5d2   : > { %v1496_v24 = vpop.f32.mrf.mxu0 }
 0x5d3   : > { %1519 = vrot.lane.b32.xlu0 %v1261_v20, %s2456_s13  ;;  %1531 = vrot.lane.b32.xlu1 %v1496_v24, %s2457_s15  ;;  %v1967_v20 = vld [vmem:[%s3102_s5] ss:$0 sm:$0xff]  ;;  %s2255_s13 = smul.u32 384, %s2541_s21  ;;  %s3056_s21 = scalar_lea.sflag [#allocation3], %s377_s16 }
 0x5d4   : > { %v2194_v26 = vpop.f32.mrf.mxu0  ;;  %p2389_p2 = por %p2388_p1, %p2387_p0 }
 0x5d5   : > { %s3053_s22 = scalar_lea.hbm %s3108_s11, %s2255_s13 }
 0x5d6   : > { %p2390_p3 = pnand %p2389_p2, %p2383_p13 }
 0x600   : > { %v1504_v29 = vpop.permute.xlu1 %1503 }
 0x601   : > { %v1536_v17 = vsel %vm570_vm2, %v781_v2, %v1504_v29 }
 0x604   : > { %v1506_v28 = vpop.permute.xlu0 %1505 }
 0x605   : > { %v1537_v32 = vsel %vm570_vm2, %v786_v4, %v1506_v28  ;;  %v1611_v4 = vld [vmem:[%s3104_s7 + $0x18] sm:$0xff] }
 0x606   : > { %2196 = vmatpush3.msra.mxu1 %v1611_v4 }
 0x607   : > { %2197 = vmatprep.subr.mxu1 %v2442_v22 }
 0x608   : > { %2198 = vmatpush3.msra.mxu1 %v1610_v5 }
 0x609   : > { %2199 = vmatprep.subr.mxu1 %v2442_v22 }
 0x60c   : > { %v1516_v53 = vpop.permute.xlu0 %1515 }
 0x60d   : > { %v1540_v25 = vsel %vm1539_vm7, %v1536_v17, %v1516_v53 }
 0x635   : > { %v1518_v56 = vpop.permute.xlu1 %1517 }
 0x636   : > { %v1541_v33 = vsel %vm1539_vm7, %v1537_v32, %v1518_v56  ;;  %v1747_v32 = vld [vmem:[%s3106_s9 + $0x60] sm:$0xff] }
 0x63d   : > { %v1528_v30 = vpop.permute.xlu1 %1527 }
 0x63e   : > { %v1543_v31 = vsel %vm663_vm5, %v1540_v25, %v1528_v30  ;;  %v1750_v25 = vld [vmem:[%s3106_s9 + $0x78] sm:$0xff]  ;;  %v1749_v30 = vld [vmem:[%s3106_s9 + $0x70] sm:$0xff] }
 0x63f   : > { %v2914_v27 = vadd.f32 %v1543_v31, %v2576_v0  ;;  %2213 = vmatpush3.msra.mxu0 %v1750_v25  ;;  %v1748_v31 = vld [vmem:[%s3106_s9 + $0x68] sm:$0xff] }
 0x640   : > { %2214 = vmatprep.subr.mxu0 %v2442_v22 }
 0x641   : > { %v1508_v34 = vpop.permute.xlu1 %1507  ;;  %v1530_v35 = vpop.permute.xlu0 %1529  ;;  %v1551_v36 = vsel %vm390_vm0, %v2914_v27, 0.0  ;;  %2215 = vmatpush3.msra.mxu0 %v1749_v30 }
 0x642   : > { %v1544_v37 = vsel %vm663_vm5, %v1541_v33, %v1530_v35  ;;  %1552 = vadd.xlane.f32.xlu0 %v1551_v36  ;;  %v1538_v41 = vsel %vm570_vm2, %v791_v6, %v1508_v34  ;;  %v1609_v6 = vld [vmem:[%s3104_s7 + $0x8] sm:$0xff]  ;;  %2216 = vmatprep.subr.mxu0 %v2442_v22  ;;  %v1746_v33 = vld [vmem:[%s3106_s9 + $0x58] sm:$0xff]  ;;  %v1745_v34 = vld [vmem:[%s3106_s9 + $0x50] sm:$0xff] }
 0x643   : > { %v2922_v40 = vadd.f32 %v2378_v39, %v1544_v37  ;;  %2200 = vmatpush3.msra.mxu1 %v1609_v6  ;;  %2217 = vmatpush3.msra.mxu0 %v1748_v31  ;;  %v1744_v35 = vld [vmem:[%s3106_s9 + $0x48] sm:$0xff]  ;;  %v1743_v36 = vld [vmem:[%s3106_s9 + $0x40] sm:$0xff]  ;;  %v1742_v37 = vld [vmem:[%s3106_s9 + $0x38] sm:$0xff] }
 0x644   : > { %2201 = vmatprep.subr.mxu1 %v2442_v22  ;;  %2218 = vmatprep.subr.mxu0 %v2442_v22  ;;  %v1741_v39 = vld [vmem:[%s3106_s9 + $0x30] sm:$0xff] }
 0x645   : > { %v1532_v0 = vpop.permute.xlu1 %1531  ;;  %v1520_v43 = vpop.permute.xlu0 %1519  ;;  %v1554_v44 = vsel %vm390_vm0, %v2922_v40, 0.0  ;;  %2202 = vmatpush3.msra.mxu1 %v1608_v7  ;;  %2219 = vmatpush3.msra.mxu0 %v1747_v32 }
 0x646   : > { %v1542_v38 = vsel %vm1539_vm7, %v1538_v41, %v1520_v43  ;;  %1555 = vadd.xlane.f32.xlu1 %v1554_v44  ;;  %2220 = vmatprep.subr.mxu0 %v2442_v22  ;;  %v1740_v41 = vld [vmem:[%s3106_s9 + $0x28] sm:$0xff]  ;;  %v1738_v43 = vld [vmem:[%s3106_s9 + $0x18] sm:$0xff]  ;;  %v1737_v44 = vld [vmem:[%s3106_s9 + $0x10] sm:$0xff] }
 0x647   : > { %v1545_v45 = vsel %vm663_vm5, %v1542_v38, %v1532_v0  ;;  %2221 = vmatpush3.msra.mxu0 %v1746_v33  ;;  %v1739_v0 = vld [vmem:[%s3106_s9 + $0x20] sm:$0xff]  ;;  %v1736_v38 = vld [vmem:[%s3106_s9 + $0x8] sm:$0xff] }
 0x648   : > { %v2930_v42 = vadd.f32 %v2379_v47, %v1545_v45  ;;  %2222 = vmatprep.subr.mxu0 %v2442_v22  ;;  %v1735_v45 = vld [vmem:[%s3106_s9] sm:$0xff] }
 0x649   : > { %2223 = vmatpush3.msra.mxu0 %v1745_v34  ;;  %v1969_v47 = vld [vmem:[%s3105_s8] ss:$0 sm:$0xff] }
 0x64a   : > { %v1557_v48 = vsel %vm390_vm0, %v2930_v42, 0.0  ;;  %2224 = vmatprep.subr.mxu0 %v2442_v22 }
 0x64b   : > { %1558 = vadd.xlane.f32.xlu0 %v1557_v48  ;;  %2225 = vmatpush3.msra.mxu0 %v1744_v35 }
 0x64c   : > { %2226 = vmatprep.subr.mxu0 %v2442_v22 }
 0x64d   : > { %2227 = vmatpush3.msra.mxu0 %v1743_v36 }
 0x64e   : > { %2228 = vmatprep.subr.mxu0 %v2442_v22 }
 0x64f   : > { %2229 = vmatpush3.msra.mxu0 %v1742_v37 }
 0x650   : > { %2230 = vmatprep.subr.mxu0 %v2442_v22 }
 0x651   : > { %2231 = vmatpush3.msra.mxu0 %v1741_v39 }
 0x652   : > { %2232 = vmatprep.subr.mxu0 %v2442_v22 }
 0x653   : > { %2233 = vmatpush3.msra.mxu0 %v1740_v41 }
 0x654   : > { %2234 = vmatprep.subr.mxu0 %v2442_v22 }
 0x655   : > { %2235 = vmatpush3.msra.mxu0 %v1739_v0 }
 0x656   : > { %2236 = vmatprep.subr.mxu0 %v2442_v22 }
 0x657   : > { %2237 = vmatpush3.msra.mxu0 %v1738_v43 }
 0x658   : > { %2238 = vmatprep.subr.mxu0 %v2442_v22 }
 0x659   : > { %2239 = vmatpush3.msra.mxu0 %v1737_v44 }
 0x65a   : > { %2240 = vmatprep.subr.mxu0 %v2442_v22 }
 0x65b   : > { %2241 = vmatpush3.msra.mxu0 %v1736_v38 }
 0x65c   : > { %2242 = vmatprep.subr.mxu0 %v2442_v22 }
 0x65d   : > { %2243 = vmatpush3.msra.mxu0 %v1735_v45 }
 0x6cb   : > { %v1553_v46 = vpop.xlane.xlu0 %1552 }
 0x6cc   : > { %v1560_v49 = vmul.f32 0.03125, %v1553_v46 }
 0x6ce   : > { %v1563_v51 = vsub.f32 %v2914_v27, %v1560_v49 }
 0x6cf   : > { %v1556_v50 = vpop.xlane.xlu1 %1555 }
 0x6d0   : > { %v1561_v52 = vmul.f32 0.03125, %v1556_v50  ;;  %v1566_v54 = vmul.f32 %v1563_v51, %v1563_v51 }
 0x6d2   : > { %v1564_v55 = vsub.f32 %v2922_v40, %v1561_v52  ;;  %v1569_v58 = vsel %vm390_vm0, %v1566_v54, 0.0 }
 0x6d3   : > { %1570 = vadd.xlane.f32.xlu0 %v1569_v58 }
 0x6d4   : > { %v1559_v59 = vpop.xlane.xlu0 %1558  ;;  %v1567_v60 = vmul.f32 %v1564_v55, %v1564_v55 }
 0x6d5   : > { %v1562_v62 = vmul.f32 0.03125, %v1559_v59 }
 0x6d6   : > { %v1572_v63 = vsel %vm390_vm0, %v1567_v60, 0.0 }
 0x6d7   : > { %v1565_v1 = vsub.f32 %v2930_v42, %v1562_v62  ;;  %1573 = vadd.xlane.f32.xlu0 %v1572_v63 }
 0x6d9   : > { %v1568_v2 = vmul.f32 %v1565_v1, %v1565_v1 }
 0x6db   : > { %v1575_v3 = vsel %vm390_vm0, %v1568_v2, 0.0 }
 0x6dc   : > { %1576 = vadd.xlane.f32.xlu1 %v1575_v3 }
 0x75c   : > { %v1571_v8 = vpop.xlane.xlu0 %1570 }
 0x75d   : > { %v1578_v9 = vmul.f32 0.03125, %v1571_v8 }
 0x75f   : > { %v1581_v10 = vadd.f32 1e-05, %v1578_v9 }
 0x760   : > { %v1574_v11 = vpop.xlane.xlu0 %1573 }
 0x761   : > { %2366 = vrsqrt.f32 %v1581_v10  ;;  %v1579_v12 = vmul.f32 0.03125, %v1574_v11 }
 0x763   : > { %v1582_v15 = vadd.f32 1e-05, %v1579_v12 }
 0x765   : > { %2368 = vrsqrt.f32 %v1582_v15  ;;  %v1577_v16 = vpop.xlane.xlu1 %1576 }
 0x766   : > { %v1580_v18 = vmul.f32 0.03125, %v1577_v16 }
 0x768   : > { %v1583_v19 = vadd.f32 1e-05, %v1580_v18 }
 0x76a   : > { %2370 = vrsqrt.f32 %v1583_v19 }
 0x76e   : > { %v2367_v14 = vpop.eup %2366 }
 0x76f   : > { %v1587_v21 = vmul.f32 %v2367_v14, %v1563_v51 }
 0x771   : > { %v1596_v23 = vmul.f32 %v1967_v20, %v1587_v21 }
 0x772   : > { %v2369_v61 = vpop.eup %2368 }
 0x773   : > { %v1605_v13 = vadd.f32 %v1968_v57, %v1596_v23  ;;  %v1588_v24 = vmul.f32 %v2369_v61, %v1564_v55 }
 0x775   : > { %2204 = vmatmul.mubr.msk.f32.vlgmr.msra.gmra.mxu1 %vm390_vm0, %v1605_v13  ;;  %v1597_v26 = vmul.f32 %v1967_v20, %v1588_v24  ;;  %v1973_v24 = vld [vmem:[%s3107_s10] ss:$0 sm:$0xff] }
 0x776   : > { %2206 = vmatprep.mubr.msk.f32.mxu1 %vm2443_vm1, %v2442_v22 }
 0x777   : > { %v2371_v29 = vpop.eup %2370  ;;  %v1606_v28 = vadd.f32 %v1968_v57, %v1597_v26 }
 0x778   : > { %v1589_v56 = vmul.f32 %v2371_v29, %v1565_v1 }
 0x779   : > { %2207 = vmatmul.mubr.msk.f32.gmra.mxu1 %vm390_vm0, %v1606_v28 }
 0x77a   : > { %2209 = vmatprep.mubr.msk.f32.mxu1 %vm2443_vm1, %v2442_v22  ;;  %v1598_v53 = vmul.f32 %v1967_v20, %v1589_v56 }
 0x77c   : > { %v1607_v17 = vadd.f32 %v1968_v57, %v1598_v53 }
 0x77e   : > { %2210 = vmatmul.mubr.msk.f32.gmra.mxu1 %vm390_vm0, %v1607_v17 }
 0x835   : > { %v1694_v48 = vpop.f32.mrf.mxu1 }
 0x836   : > { %v1695_v46 = vadd.f32 %v1969_v47, %v1694_v48 }
 0x837   : > { %v2205_v49 = vpop.f32.mrf.mxu1 }
 0x838   : > { %v1711_v51 = vmul.f32 0.044715, %v1695_v46  ;;  %v1708_v15 = vmul.f32 0.5, %v1695_v46 }
 0x839   : > { %v1699_v50 = vpop.f32.mrf.mxu1 }
 0x83a   : > { %v1714_v52 = vmul.f32 %v1711_v51, %v1695_v46  ;;  %v1700_v54 = vadd.f32 %v1969_v47, %v1699_v50 }
 0x83b   : > { %v2208_v55 = vpop.f32.mrf.mxu1 }
 0x83c   : > { %v1717_v58 = vmul.f32 %v1714_v52, %v1695_v46  ;;  %v1712_v59 = vmul.f32 0.044715, %v1700_v54  ;;  %v1709_v14 = vmul.f32 0.5, %v1700_v54 }
 0x83e   : > { %v1720_v60 = vadd.f32 %v1717_v58, %v1695_v46  ;;  %v1715_v62 = vmul.f32 %v1712_v59, %v1700_v54  ;;  %v1704_v63 = vpop.f32.mrf.mxu1 }
 0x83f   : > { %v1705_v1 = vadd.f32 %v1969_v47, %v1704_v63 }
 0x840   : > { %v1723_v2 = vmul.f32 0.7978846, %v1720_v60  ;;  %v2211_v3 = vpop.f32.mrf.mxu1  ;;  %v1718_v4 = vmul.f32 %v1715_v62, %v1700_v54 }
 0x841   : > { %v1713_v5 = vmul.f32 0.044715, %v1705_v1  ;;  %v1710_v23 = vmul.f32 0.5, %v1705_v1 }
 0x842   : > { %2372 = vtanh.f32 %v1723_v2  ;;  %v1721_v6 = vadd.f32 %v1718_v4, %v1700_v54 }
 0x843   : > { %v1716_v7 = vmul.f32 %v1713_v5, %v1705_v1 }
 0x844   : > { %v1724_v8 = vmul.f32 0.7978846, %v1721_v6 }
 0x845   : > { %v1719_v9 = vmul.f32 %v1716_v7, %v1705_v1 }
 0x846   : > { %2374 = vtanh.f32 %v1724_v8 }
 0x847   : > { %v1722_v10 = vadd.f32 %v1719_v9, %v1705_v1 }
 0x849   : > { %v1725_v11 = vmul.f32 0.7978846, %v1722_v10 }
 0x84b   : > { %2376 = vtanh.f32 %v1725_v11 }
 0x84f   : > { %v2373_v12 = vpop.eup %2372 }
 0x850   : > { %v1729_v16 = vadd.f32 1.0, %v2373_v12 }
 0x852   : > { %v1732_v18 = vmul.f32 %v1729_v16, %v1708_v15 }
 0x853   : > { %v2375_v19 = vpop.eup %2374 }
 0x854   : > { %2245 = vmatmul.mubr.f32.vlgmr.msra.gmra.mxu0 %v1732_v18  ;;  %v1730_v20 = vadd.f32 1.0, %v2375_v19 }
 0x855   : > { %2247 = vmatprep.mubr.msk.f32.mxu0 %vm2443_vm1, %v2442_v22 }
 0x856   : > { %v1733_v21 = vmul.f32 %v1730_v20, %v1709_v14 }
 0x858   : > { %v2377_v57 = vpop.eup %2376  ;;  %2248 = vmatmul.mubr.f32.gmra.mxu0 %v1733_v21 }
 0x859   : > { %2250 = vmatprep.mubr.msk.f32.mxu0 %vm2443_vm1, %v2442_v22  ;;  %v1731_v61 = vadd.f32 1.0, %v2377_v57 }
 0x85b   : > { %v1734_v13 = vmul.f32 %v1731_v61, %v1710_v23 }
 0x85d   : > { %2251 = vmatmul.mubr.f32.gmra.mxu0 %v1734_v13 }
 0x914   : > { %v1824_v26 = vpop.f32.mrf.mxu0 }
 0x915   : > { %v1825_v29 = vadd.f32 %v1973_v24, %v1824_v26 }
 0x916   : > { %v2246_v28 = vpop.f32.mrf.mxu0 }
 0x917   : > { %v1838_v56 = vadd.f32 %v1825_v29, %v2914_v27 }
 0x918   : > { %v1829_v53 = vpop.f32.mrf.mxu0 }
 0x919   : > { %1841 = vst.msk [vmem:[%s379_s29] sm:$0xff] %vm390_vm0, %v1838_v56  ;;  %v1830_v22 = vadd.f32 %v1973_v24, %v1829_v53 }
 0x91a   : > { %v2249_v17 = vpop.f32.mrf.mxu0 }
 0x91b   : > { %v1839_v25 = vadd.f32 %v1830_v22, %v2922_v40 }
 0x91d   : > { %1842 = vst.msk [vmem:[%s379_s29 + $0x8] sm:$0xff] %vm390_vm0, %v1839_v25  ;;  %v1834_v30 = vpop.f32.mrf.mxu0 }
 0x91e   : > { %v1835_v31 = vadd.f32 %v1973_v24, %v1834_v30 }
 0x91f   : > { %v2252_v27 = vpop.f32.mrf.mxu0 }
 0x920   : > { %v1840_v32 = vadd.f32 %v1835_v31, %v2930_v42 }
 0x922   : > { %1843 = vst.msk [vmem:[%s379_s29 + $0x10] sm:$0xff] %vm390_vm0, %v1840_v32 }
 0x923   : > { %2393 = shalt.err (!%p2390_p3)
}
 0x924   : > { %s2394_s16 = scalar_lea.hbm %s3053_s22, 384  ;;  %s2398_s15 = scalar_lea.hbm %s3108_s11, 768 }
 0x925   : > { %p2395_p4 = scmp.ne.s32.totalorder %s3053_s22, %s2394_s16  ;;  %p2399_p9 = scmp.lt.s32.totalorder %s3053_s22, %s3108_s11 }
 0x926   : > { %p2400_p10 = scmp.lt.s32.totalorder %s2398_s15, %s2394_s16 }
 0x927   : > { %p2396_p7 = pnand %p2395_p4, %p2558_p5 }
 0x928   : > { %p2401_p11 = por %p2400_p10, %p2399_p9 }
 0x929   : > { %p2397_p8 = pneg %p2396_p7 }
 0x92b   : > { %p2402_p12 = pnand %p2401_p11, %p2397_p8 }
 0x92d   : > { %2405 = shalt.err (!%p2402_p12)
}
 0x92e   : > { %s2459_s0 = smov 128   ;;  %s3114_s12 = smov 8  }
 0x92f   : > { %2256 = dma.vmem_to_hbm [thread:$0]  (%p2558_p5), %s3047_s30, 384, %s3053_s22, %s3056_s21, %s2459_s0, %s2459_s0, %s3114_s12  }
 0x930 PF: > { %p2262_p13 = scmp.ge.s32.totalorder %s2440_s20, 2  ;;  %s1873_s24 = sand.u32 1, %s2428_s17  }
 0x931   : > { %s1874_s16 = scalar_lea.sflag [#allocation3], %s1873_s24 }
 0x932   : > { %p2259_p0 = pnand %p2262_p13, %p2562_p6 }
 0x934   : > { %p2260_p1 = pneg %p2259_p0 }
 0x936   : > { %2423 = dma.done.wait (%p2260_p1), %s1874_s16, 384  }
 0x937   : > { %2425 = vsyncadd (%p2260_p1), %s1874_s16, 4294966912  ;;  %p21_p2 = scmp.ge.s32.totalorder %s2545_s23, 4   ;;  %s3115_s17 = smov %s2432_s18 }
 0x938   : > { %s3116_s18 = smov %s2436_s19  ;;  %s3117_s19 = smov %s2556_s26 }
 0x939   : > { %s3118_s20 = smov %s2545_s23  ;;  %23 = sbr.rel (!%p21_p2) target bundleno = 5 (0x5), region = 99 }
 0x93e   :  { %1879 = vsyncpa [#allocation3], 1 }
 0x93f   :  { %1881 = vsyncpa [#allocation3 + $0x1], 1 }

</bundles_post_ra>
